<compile_context>
chip_gen: v5e
topology: v5e:2x2
jax: 0.10.0
libtpu: 0.0.40
codegen_flags: <defaults>
</compile_context>

<pallas_src>
import functools

import jax
import jax.numpy as jnp
from jax.experimental import pallas as pl
from jax.experimental.pallas import tpu as pltpu

_MASK = -1e30  # finite "minus infinity" (plain Python float -> no captured constant)


def _gated_attention_kernel(x_ref, wvu_ref, bvu_ref, ww_ref, bw_ref,
                            wc_ref, bc_ref,
                            logits_ref, a_ref,
                            m_sc, l_sc, z_sc,
                            *, n_valid, tile_n):
    i = pl.program_id(0)
    last = pl.num_programs(0) - 1
    L = ww_ref.shape[1]

    @pl.when(i == 0)
    def _init():
        m_sc[...] = jnp.full_like(m_sc, _MASK)
        l_sc[...] = jnp.zeros_like(l_sc)
        z_sc[...] = jnp.zeros_like(z_sc)

    x = x_ref[...]                                                  # [TN, M_pad] f32

    # Fused attention_V | attention_U projection: one MXU matmul, then split.
    vu = jnp.dot(x, wvu_ref[...],
                 preferred_element_type=jnp.float32) + bvu_ref[...]  # [TN, 2L]
    gated = jnp.tanh(vu[:, :L]) * jax.nn.sigmoid(vu[:, L:])          # [TN, L]

    # attention_w: contract over L with the [1, L] weight as LHS so the result
    # comes out lane-dense as [1, TN] (q @ k^T style, no explicit transpose).
    s = jax.lax.dot_general(ww_ref[...], gated,
                            (((1,), (1,)), ((), ())),
                            preferred_element_type=jnp.float32) + bw_ref[...]  # [1, TN]

    # Mask padded tail rows of the bag.
    col = jax.lax.broadcasted_iota(jnp.int32, s.shape, 1) + i * tile_n
    s = jnp.where(col < n_valid, s, _MASK)

    # Stash raw masked scores into the lane-dense, VMEM-resident A output;
    # they are normalized in-kernel at the final step.
    a_ref[:, pl.ds(pl.multiple_of(i * tile_n, tile_n), tile_n)] = s

    # Online-softmax update of (m, l, z).
    m_prev = m_sc[...]                                               # [1, 1]
    m_new = jnp.maximum(m_prev, jnp.max(s, axis=1, keepdims=True))
    alpha = jnp.exp(m_prev - m_new)
    p = jnp.exp(s - m_new)                                           # padded lanes -> 0
    l_sc[...] = alpha * l_sc[...] + jnp.sum(p, axis=1, keepdims=True)
    z_sc[...] = alpha * z_sc[...] + jnp.dot(p, x, preferred_element_type=jnp.float32)
    m_sc[...] = m_new

    @pl.when(i == last)
    def _finalize():
        inv_l = pl.reciprocal(l_sc[...], approx=False)               # [1, 1]
        z = z_sc[...] * inv_l                                        # [1, M_pad]
        logits_ref[...] = jnp.dot(z, wc_ref[...],
                                  preferred_element_type=jnp.float32) + bc_ref[...]
        # Normalize the stored raw scores into the softmax attention weights A.
        a_ref[...] = jnp.exp(a_ref[...] - m_sc[...]) * inv_l


def gated_attention_forward(x, params, *, tile_n=128):
    """Returns (logits [1,C], Y_prob [1,C], Y_hat [1] int32, A [1,N])."""
    N, M = x.shape
    L = params["wv"].shape[1]
    C = params["wc"].shape[1]
    assert tile_n % 8 == 0

    f32 = jnp.float32
    m_pad = ((M + 127) // 128) * 128
    n_pad = ((N + tile_n - 1) // tile_n) * tile_n
    num_tiles = n_pad // tile_n

    # Zero-pad the feature dim to whole 128-lane vregs and the bag dim to a
    # whole number of tiles; build the fused [M_pad, 2L] V|U weight.
    xp = jnp.zeros((n_pad, m_pad), f32).at[:N, :M].set(x.astype(f32))
    wvu = (jnp.zeros((m_pad, 2 * L), f32)
           .at[:M, :L].set(params["wv"])
           .at[:M, L:].set(params["wu"]))
    bvu = jnp.concatenate([params["bv"], params["bu"]], axis=1)       # [1, 2L]
    wc = jnp.zeros((m_pad, C), f32).at[:M, :].set(params["wc"])

    kernel = functools.partial(_gated_attention_kernel,
                               n_valid=N, tile_n=tile_n)

    grid_spec = pltpu.PrefetchScalarGridSpec(
        num_scalar_prefetch=0,
        grid=(num_tiles,),
        in_specs=[
            pl.BlockSpec((tile_n, m_pad), lambda i: (i, 0)),   # x (streamed tiles)
            pl.BlockSpec((m_pad, 2 * L), lambda i: (0, 0)),    # fused Wv|Wu (resident)
            pl.BlockSpec((1, 2 * L), lambda i: (0, 0)),        # bv|bu
            pl.BlockSpec((1, L), lambda i: (0, 0)),            # attention_w weight (row)
            pl.BlockSpec((1, 1), lambda i: (0, 0)),            # attention_w bias
            pl.BlockSpec((m_pad, C), lambda i: (0, 0)),        # classifier weight
            pl.BlockSpec((1, C), lambda i: (0, 0)),            # classifier bias
        ],
        out_specs=(
            pl.BlockSpec((1, C), lambda i: (0, 0)),            # logits
            pl.BlockSpec((1, n_pad), lambda i: (0, 0)),        # A (lane-dense, resident)
        ),
        scratch_shapes=[
            pltpu.VMEM((1, 1), f32),        # running max m
            pltpu.VMEM((1, 1), f32),        # running sum l
            pltpu.VMEM((1, m_pad), f32),    # running weighted accumulator z
        ],
    )

    logits, a_full = pl.pallas_call(
        kernel,
        out_shape=(jax.ShapeDtypeStruct((1, C), f32),
                   jax.ShapeDtypeStruct((1, n_pad), f32)),
        grid_spec=grid_spec,
        compiler_params=pltpu.CompilerParams(
            dimension_semantics=("arbitrary",)),
    )(xp, wvu, bvu, params["ww"], params["bw"], wc, params["bc"])

    A = a_full[:, :N]                                    # drop padded bag columns
    y_prob = jax.nn.softmax(logits, axis=1)              # tiny [1, C] epilogue in XLA
    y_hat = jnp.argmax(logits, axis=1).astype(jnp.int32)
    return logits, y_prob, y_hat, A


def init_params(key, M, L, C):
    """Deterministic PyTorch-Linear-style init: U(-1/sqrt(fan_in), 1/sqrt(fan_in))."""
    def linear(k, fan_in, fan_out):
        kw, kb = jax.random.split(k)
        bound = 1.0 / (fan_in ** 0.5)
        w = jax.random.uniform(kw, (fan_in, fan_out), jnp.float32, -bound, bound)
        b = jax.random.uniform(kb, (1, fan_out), jnp.float32, -bound, bound)
        return w, b

    k1, k2, k3, k4 = jax.random.split(key, 4)
    wv, bv = linear(k1, M, L)           # attention_V
    wu, bu = linear(k2, M, L)           # attention_U
    ww_col, bw = linear(k3, L, 1)       # attention_w ([L,1]); kernel wants [1,L]
    wc, bc = linear(k4, M, C)           # classifier
    return dict(wv=wv, bv=bv, wu=wu, bu=bu, ww=ww_col.T, bw=bw, wc=wc, bc=bc)


def _reference_forward(x, p):
    a_v = jnp.tanh(x @ p["wv"] + p["bv"])
    a_u = jax.nn.sigmoid(x @ p["wu"] + p["bu"])
    a = (a_v * a_u) @ p["ww"].T + p["bw"]          # [N, 1]
    a = jax.nn.softmax(a.T, axis=1)                # [1, N]
    z = a @ x                                      # [1, M]
    logits = z @ p["wc"] + p["bc"]                 # [1, C]
    y_prob = jax.nn.softmax(logits, axis=1)
    y_hat = jnp.argmax(logits, axis=1).astype(jnp.int32)
    return logits, y_prob, y_hat, a


if __name__ == "__main__":
    # size='tiny' -> [M, L, _] = [192, 128, 128]
    M, L = 192, 128
    n_classes = 2
    N = 200  # bag size; not a multiple of the 128-row tile -> exercises tail masking

    key = jax.random.PRNGKey(0)
    kx, kp = jax.random.split(key)
    x = jax.random.normal(kx, (N, M), dtype=jnp.float32)
    params = init_params(kp, M, L, n_classes)

    outs = gated_attention_forward(x, params)
    jax.block_until_ready(outs)
    logits, y_prob, y_hat, A = outs

    # correctness check vs. plain-JAX reference
    r_logits, r_prob, r_yhat, r_A = _reference_forward(x, params)
    assert logits.shape == (1, n_classes) and y_prob.shape == (1, n_classes)
    assert y_hat.shape == (1,) and A.shape == (1, N)
    assert jnp.allclose(logits, r_logits, atol=1e-4, rtol=1e-4)
    assert jnp.allclose(y_prob, r_prob, atol=1e-5, rtol=1e-4)
    assert jnp.allclose(A, r_A, atol=1e-5, rtol=1e-4)
    assert int(y_hat[0]) == int(r_yhat[0])

    print("KERNEL_OK")
</pallas_src>

<mosaic_0001>
module attributes {stable_mosaic.version = 11 : i64} {
  func.func @_gated_attention_kernel(%arg0: i32, %arg1: memref<128x256xf32, #tpu.memory_space<vmem>>, %arg2: memref<256x256xf32, #tpu.memory_space<vmem>>, %arg3: memref<1x256xf32, #tpu.memory_space<vmem>>, %arg4: memref<1x128xf32, #tpu.memory_space<vmem>>, %arg5: memref<1x1xf32, #tpu.memory_space<vmem>>, %arg6: memref<256x2xf32, #tpu.memory_space<vmem>>, %arg7: memref<1x2xf32, #tpu.memory_space<vmem>>, %arg8: memref<1x2xf32, #tpu.memory_space<vmem>>, %arg9: memref<1x256xf32, #tpu.memory_space<vmem>>, %arg10: memref<1x1xf32, #tpu.memory_space<vmem>>, %arg11: memref<1x1xf32, #tpu.memory_space<vmem>>, %arg12: memref<1x256xf32, #tpu.memory_space<vmem>>) attributes {dimension_semantics = [#tpu.dimension_semantics<arbitrary>], iteration_bounds = array<i64: 2>, scalar_prefetch = 0 : i64, scratch_operands = 3 : i64, tpu.core_type = #tpu.core_type<tc>, window_params = [{transform_indices = @transform_0, window_bounds = array<i64: 128, 256>}, {pipeline_mode = #tpu.pipeline_mode<synchronous>, transform_indices = @transform_1, window_bounds = array<i64: 256, 256>}, {pipeline_mode = #tpu.pipeline_mode<synchronous>, transform_indices = @transform_2, window_bounds = array<i64: 1, 256>}, {pipeline_mode = #tpu.pipeline_mode<synchronous>, transform_indices = @transform_3, window_bounds = array<i64: 1, 128>}, {pipeline_mode = #tpu.pipeline_mode<synchronous>, transform_indices = @transform_4, window_bounds = array<i64: 1, 1>}, {pipeline_mode = #tpu.pipeline_mode<synchronous>, transform_indices = @transform_5, window_bounds = array<i64: 256, 2>}, {pipeline_mode = #tpu.pipeline_mode<synchronous>, transform_indices = @transform_6, window_bounds = array<i64: 1, 2>}, {pipeline_mode = #tpu.pipeline_mode<synchronous>, transform_indices = @transform_7, window_bounds = array<i64: 1, 2>}, {pipeline_mode = #tpu.pipeline_mode<synchronous>, transform_indices = @transform_8, window_bounds = array<i64: 1, 256>}]} {
    %c0_i32 = arith.constant 0 : i32
    %0 = arith.cmpi eq, %arg0, %c0_i32 : i32
    %1 = arith.extui %0 : i1 to i32
    %c0_i32_0 = arith.constant 0 : i32
    %2 = arith.cmpi ne, %1, %c0_i32_0 : i32
    scf.if %2 {
      %cst_31 = arith.constant -1.000000e+30 : f32
      %60 = vector.broadcast %cst_31 : f32 to vector<1x1xf32>
      %c0_32 = arith.constant 0 : index
      %c0_33 = arith.constant 0 : index
      %61 = vector.load %arg10[%c0_32, %c0_33] : memref<1x1xf32, #tpu.memory_space<vmem>>, vector<1x1xf32>
      tpu.vector_store %arg10[%c0_32, %c0_33], %60 {strides = array<i32>} : memref<1x1xf32, #tpu.memory_space<vmem>>, vector<1x1xf32>,
      %cst_34 = arith.constant 0.000000e+00 : f32
      %62 = vector.broadcast %cst_34 : f32 to vector<1x1xf32>
      %c0_35 = arith.constant 0 : index
      %c0_36 = arith.constant 0 : index
      %63 = vector.load %arg11[%c0_35, %c0_36] : memref<1x1xf32, #tpu.memory_space<vmem>>, vector<1x1xf32>
      tpu.vector_store %arg11[%c0_35, %c0_36], %62 {strides = array<i32>} : memref<1x1xf32, #tpu.memory_space<vmem>>, vector<1x1xf32>,
      %cst_37 = arith.constant 0.000000e+00 : f32
      %64 = vector.broadcast %cst_37 : f32 to vector<1x256xf32>
      %c0_38 = arith.constant 0 : index
      %c0_39 = arith.constant 0 : index
      %65 = vector.load %arg12[%c0_38, %c0_39] : memref<1x256xf32, #tpu.memory_space<vmem>>, vector<1x256xf32>
      tpu.vector_store %arg12[%c0_38, %c0_39], %64 {strides = array<i32>} : memref<1x256xf32, #tpu.memory_space<vmem>>, vector<1x256xf32>,
    } else {
    }
    %c0 = arith.constant 0 : index
    %c0_1 = arith.constant 0 : index
    %3 = vector.load %arg1[%c0, %c0_1] : memref<128x256xf32, #tpu.memory_space<vmem>>, vector<128x256xf32>
    %c0_2 = arith.constant 0 : index
    %c0_3 = arith.constant 0 : index
    %4 = vector.load %arg2[%c0_2, %c0_3] : memref<256x256xf32, #tpu.memory_space<vmem>>, vector<256x256xf32>
    %cst = arith.constant dense<0.000000e+00> : vector<128x256xf32>
    %5 = tpu.matmul %3, %4, %cst {dimension_numbers = #tpu.dot_dimension_numbers<[1], [0], [0], [1], [0, 0, 1, 1], [], []>} : vector<128x256xf32>, vector<256x256xf32>, vector<128x256xf32> -> vector<128x256xf32>
    %c0_4 = arith.constant 0 : index
    %c0_5 = arith.constant 0 : index
    %6 = vector.load %arg3[%c0_4, %c0_5] : memref<1x256xf32, #tpu.memory_space<vmem>>, vector<1x256xf32>
    %7 = vector.broadcast %6 : vector<1x256xf32> to vector<128x256xf32>
    %8 = arith.addf %5, %7 : vector<128x256xf32>
    %9 = vector.extract_strided_slice %8 {offsets = [0, 0], sizes = [128, 128], strides = [1, 1]} : vector<128x256xf32> to vector<128x128xf32>
    %10 = math.tanh %9 : vector<128x128xf32>
    %11 = vector.extract_strided_slice %8 {offsets = [0, 128], sizes = [128, 128], strides = [1, 1]} : vector<128x256xf32> to vector<128x128xf32>
    %12 = arith.negf %11 : vector<128x128xf32>
    %13 = math.exp %12 : vector<128x128xf32>
    %cst_6 = arith.constant 1.000000e+00 : f32
    %14 = vector.broadcast %cst_6 : f32 to vector<128x128xf32>
    %15 = arith.addf %14, %13 : vector<128x128xf32>
    %16 = arith.divf %14, %15 : vector<128x128xf32>
    %17 = arith.mulf %10, %16 : vector<128x128xf32>
    %c0_7 = arith.constant 0 : index
    %c0_8 = arith.constant 0 : index
    %18 = vector.load %arg4[%c0_7, %c0_8] : memref<1x128xf32, #tpu.memory_space<vmem>>, vector<1x128xf32>
    %cst_9 = arith.constant dense<0.000000e+00> : vector<1x128xf32>
    %19 = tpu.matmul %18, %17, %cst_9 {dimension_numbers = #tpu.dot_dimension_numbers<[1], [1], [0], [0], [0, 0, 1, 0], [], []>} : vector<1x128xf32>, vector<128x128xf32>, vector<1x128xf32> -> vector<1x128xf32>
    %c0_10 = arith.constant 0 : index
    %c0_11 = arith.constant 0 : index
    %20 = vector.load %arg5[%c0_10, %c0_11] : memref<1x1xf32, #tpu.memory_space<vmem>>, vector<1x1xf32>
    %21 = vector.broadcast %20 : vector<1x1xf32> to vector<1x128xf32>
    %22 = arith.addf %19, %21 : vector<1x128xf32>
    %23 = tpu.iota {dimensions = array<i32: 1>} : vector<1x128xi32>
    %c128_i32 = arith.constant 128 : i32
    %24 = arith.muli %arg0, %c128_i32 : i32
    %25 = vector.broadcast %24 : i32 to vector<1x128xi32>
    %26 = arith.addi %23, %25 : vector<1x128xi32>
    %c200_i32 = arith.constant 200 : i32
    %27 = vector.broadcast %c200_i32 : i32 to vector<1x128xi32>
    %28 = arith.cmpi slt, %26, %27 : vector<1x128xi32>
    %cst_12 = arith.constant -1.000000e+30 : f32
    %29 = vector.broadcast %cst_12 : f32 to vector<1x128xf32>
    %30 = arith.select %28, %22, %29 : vector<1x128xi1>, vector<1x128xf32>
    %c128_i32_13 = arith.constant 128 : i32
    %31 = arith.muli %arg0, %c128_i32_13 : i32
    %32 = tpu.assume_multiple %31, 128 : i32
    %c0_14 = arith.constant 0 : index
    %33 = arith.index_cast %32 : i32 to index
    %34 = vector.load %arg9[%c0_14, %33] : memref<1x256xf32, #tpu.memory_space<vmem>>, vector<1x128xf32>
    tpu.vector_store %arg9[%c0_14, %33], %30 {strides = array<i32>} : memref<1x256xf32, #tpu.memory_space<vmem>>, vector<1x128xf32>,
    %c0_15 = arith.constant 0 : index
    %c0_16 = arith.constant 0 : index
    %35 = vector.load %arg10[%c0_15, %c0_16] : memref<1x1xf32, #tpu.memory_space<vmem>>, vector<1x1xf32>
    %cst_17 = arith.constant dense<0xFF800000> : vector<1xf32>
    %36 = vector.multi_reduction <maximumf>, %30, %cst_17 [1] : vector<1x128xf32> to vector<1xf32>
    %37 = vector.shape_cast %36 : vector<1xf32> to vector<1x1xf32>
    %38 = arith.maximumf %35, %37 : vector<1x1xf32>
    %39 = arith.subf %35, %38 : vector<1x1xf32>
    %40 = math.exp %39 : vector<1x1xf32>
    %41 = vector.broadcast %38 : vector<1x1xf32> to vector<1x128xf32>
    %42 = arith.subf %30, %41 : vector<1x128xf32>
    %43 = math.exp %42 : vector<1x128xf32>
    %c0_18 = arith.constant 0 : index
    %c0_19 = arith.constant 0 : index
    %44 = vector.load %arg11[%c0_18, %c0_19] : memref<1x1xf32, #tpu.memory_space<vmem>>, vector<1x1xf32>
    %45 = arith.mulf %40, %44 : vector<1x1xf32>
    %cst_20 = arith.constant dense<0.000000e+00> : vector<1xf32>
    %46 = vector.multi_reduction <add>, %43, %cst_20 [1] : vector<1x128xf32> to vector<1xf32>
    %47 = vector.shape_cast %46 : vector<1xf32> to vector<1x1xf32>
    %48 = arith.addf %45, %47 : vector<1x1xf32>
    %c0_21 = arith.constant 0 : index
    %c0_22 = arith.constant 0 : index
    %49 = vector.load %arg11[%c0_21, %c0_22] : memref<1x1xf32, #tpu.memory_space<vmem>>, vector<1x1xf32>
    tpu.vector_store %arg11[%c0_21, %c0_22], %48 {strides = array<i32>} : memref<1x1xf32, #tpu.memory_space<vmem>>, vector<1x1xf32>,
    %c0_23 = arith.constant 0 : index
    %c0_24 = arith.constant 0 : index
    %50 = vector.load %arg12[%c0_23, %c0_24] : memref<1x256xf32, #tpu.memory_space<vmem>>, vector<1x256xf32>
    %51 = vector.broadcast %40 : vector<1x1xf32> to vector<1x256xf32>
    %52 = arith.mulf %51, %50 : vector<1x256xf32>
    %cst_25 = arith.constant dense<0.000000e+00> : vector<1x256xf32>
    %53 = tpu.matmul %43, %3, %cst_25 {dimension_numbers = #tpu.dot_dimension_numbers<[1], [0], [0], [1], [0, 0, 1, 1], [], []>} : vector<1x128xf32>, vector<128x256xf32>, vector<1x256xf32> -> vector<1x256xf32>
    %54 = arith.addf %52, %53 : vector<1x256xf32>
    %c0_26 = arith.constant 0 : index
    %c0_27 = arith.constant 0 : index
    %55 = vector.load %arg12[%c0_26, %c0_27] : memref<1x256xf32, #tpu.memory_space<vmem>>, vector<1x256xf32>
    tpu.vector_store %arg12[%c0_26, %c0_27], %54 {strides = array<i32>} : memref<1x256xf32, #tpu.memory_space<vmem>>, vector<1x256xf32>,
    %c0_28 = arith.constant 0 : index
    %c0_29 = arith.constant 0 : index
    %56 = vector.load %arg10[%c0_28, %c0_29] : memref<1x1xf32, #tpu.memory_space<vmem>>, vector<1x1xf32>
    tpu.vector_store %arg10[%c0_28, %c0_29], %38 {strides = array<i32>} : memref<1x1xf32, #tpu.memory_space<vmem>>, vector<1x1xf32>,
    %c1_i32 = arith.constant 1 : i32
    %57 = arith.cmpi eq, %arg0, %c1_i32 : i32
    %58 = arith.extui %57 : i1 to i32
    %c0_i32_30 = arith.constant 0 : i32
    %59 = arith.cmpi ne, %58, %c0_i32_30 : i32
    scf.if %59 {
      %c0_31 = arith.constant 0 : index
      %c0_32 = arith.constant 0 : index
      %60 = vector.load %arg11[%c0_31, %c0_32] : memref<1x1xf32, #tpu.memory_space<vmem>>, vector<1x1xf32>
      %61 = tpu.reciprocal %60 : vector<1x1xf32> -> vector<1x1xf32>
      %c0_33 = arith.constant 0 : index
      %c0_34 = arith.constant 0 : index
      %62 = vector.load %arg12[%c0_33, %c0_34] : memref<1x256xf32, #tpu.memory_space<vmem>>, vector<1x256xf32>
      %63 = vector.broadcast %61 : vector<1x1xf32> to vector<1x256xf32>
      %64 = arith.mulf %62, %63 : vector<1x256xf32>
      %c0_35 = arith.constant 0 : index
      %c0_36 = arith.constant 0 : index
      %65 = vector.load %arg6[%c0_35, %c0_36] : memref<256x2xf32, #tpu.memory_space<vmem>>, vector<256x2xf32>
      %cst_37 = arith.constant dense<0.000000e+00> : vector<1x2xf32>
      %66 = tpu.matmul %64, %65, %cst_37 {dimension_numbers = #tpu.dot_dimension_numbers<[1], [0], [0], [1], [0, 0, 1, 1], [], []>} : vector<1x256xf32>, vector<256x2xf32>, vector<1x2xf32> -> vector<1x2xf32>
      %c0_38 = arith.constant 0 : index
      %c0_39 = arith.constant 0 : index
      %67 = vector.load %arg7[%c0_38, %c0_39] : memref<1x2xf32, #tpu.memory_space<vmem>>, vector<1x2xf32>
      %68 = arith.addf %66, %67 : vector<1x2xf32>
      %c0_40 = arith.constant 0 : index
      %c0_41 = arith.constant 0 : index
      %69 = vector.load %arg8[%c0_40, %c0_41] : memref<1x2xf32, #tpu.memory_space<vmem>>, vector<1x2xf32>
      tpu.vector_store %arg8[%c0_40, %c0_41], %68 {strides = array<i32>} : memref<1x2xf32, #tpu.memory_space<vmem>>, vector<1x2xf32>,
      %c0_42 = arith.constant 0 : index
      %c0_43 = arith.constant 0 : index
      %70 = vector.load %arg9[%c0_42, %c0_43] : memref<1x256xf32, #tpu.memory_space<vmem>>, vector<1x256xf32>
      %c0_44 = arith.constant 0 : index
      %c0_45 = arith.constant 0 : index
      %71 = vector.load %arg10[%c0_44, %c0_45] : memref<1x1xf32, #tpu.memory_space<vmem>>, vector<1x1xf32>
      %72 = vector.broadcast %71 : vector<1x1xf32> to vector<1x256xf32>
      %73 = arith.subf %70, %72 : vector<1x256xf32>
      %74 = math.exp %73 : vector<1x256xf32>
      %75 = vector.broadcast %61 : vector<1x1xf32> to vector<1x256xf32>
      %76 = arith.mulf %74, %75 : vector<1x256xf32>
      %c0_46 = arith.constant 0 : index
      %c0_47 = arith.constant 0 : index
      %77 = vector.load %arg9[%c0_46, %c0_47] : memref<1x256xf32, #tpu.memory_space<vmem>>, vector<1x256xf32>
      tpu.vector_store %arg9[%c0_46, %c0_47], %76 {strides = array<i32>} : memref<1x256xf32, #tpu.memory_space<vmem>>, vector<1x256xf32>,
    } else {
    }
    return
  }
  func.func @transform_0(%arg0: i32) -> (i32, i32) {
    %c0_i32 = arith.constant 0 : i32
    %c0_i32_0 = arith.constant 0 : i32
    return %arg0, %c0_i32 : i32, i32
  }
  func.func @transform_1(%arg0: i32) -> (i32, i32) {
    %c0_i32 = arith.constant 0 : i32
    %c0_i32_0 = arith.constant 0 : i32
    %c0_i32_1 = arith.constant 0 : i32
    return %c0_i32, %c0_i32_0 : i32, i32
  }
  func.func @transform_2(%arg0: i32) -> (i32, i32) {
    %c0_i32 = arith.constant 0 : i32
    %c0_i32_0 = arith.constant 0 : i32
    %c0_i32_1 = arith.constant 0 : i32
    return %c0_i32, %c0_i32_0 : i32, i32
  }
  func.func @transform_3(%arg0: i32) -> (i32, i32) {
    %c0_i32 = arith.constant 0 : i32
    %c0_i32_0 = arith.constant 0 : i32
    %c0_i32_1 = arith.constant 0 : i32
    return %c0_i32, %c0_i32_0 : i32, i32
  }
  func.func @transform_4(%arg0: i32) -> (i32, i32) {
    %c0_i32 = arith.constant 0 : i32
    %c0_i32_0 = arith.constant 0 : i32
    %c0_i32_1 = arith.constant 0 : i32
    return %c0_i32, %c0_i32_0 : i32, i32
  }
  func.func @transform_5(%arg0: i32) -> (i32, i32) {
    %c0_i32 = arith.constant 0 : i32
    %c0_i32_0 = arith.constant 0 : i32
    %c0_i32_1 = arith.constant 0 : i32
    return %c0_i32, %c0_i32_0 : i32, i32
  }
  func.func @transform_6(%arg0: i32) -> (i32, i32) {
    %c0_i32 = arith.constant 0 : i32
    %c0_i32_0 = arith.constant 0 : i32
    %c0_i32_1 = arith.constant 0 : i32
    return %c0_i32, %c0_i32_0 : i32, i32
  }
  func.func @transform_7(%arg0: i32) -> (i32, i32) {
    %c0_i32 = arith.constant 0 : i32
    %c0_i32_0 = arith.constant 0 : i32
    %c0_i32_1 = arith.constant 0 : i32
    return %c0_i32, %c0_i32_0 : i32, i32
  }
  func.func @transform_8(%arg0: i32) -> (i32, i32) {
    %c0_i32 = arith.constant 0 : i32
    %c0_i32_0 = arith.constant 0 : i32
    %c0_i32_1 = arith.constant 0 : i32
    return %c0_i32, %c0_i32_0 : i32, i32
  }
}

</mosaic_0001>

<bundles_post_ra>
// kernel: tpu_custom_call.1
= control target key start
LH: loop header
LB: loop body
LE: loop exit
PB: predicated region body
PF: predicated region fallthrough
CT: control target
= control target key end

     0   :  { %s2424_s0 = inlined_call_operand.hbm [shape: f32[256,256], index: 0, kind: input, shape index: {}]   ;;  %s2425_s1 = inlined_call_operand.hbm [shape: f32[256,256], index: 1, kind: input, shape index: {}]   ;;  %s2426_s2 = inlined_call_operand.vmem [shape: f32[1,256], index: 2, kind: input, shape index: {}]   ;;  %s2427_s3 = inlined_call_operand.vmem [shape: f32[1,128], index: 3, kind: input, shape index: {}]   ;;  %s2428_s4 = inlined_call_operand.<no memory space> [shape: f32[1,1], index: 4, kind: input, shape index: {}]   ;;  %s2429_s5 = inlined_call_operand.vmem [shape: f32[256,2], index: 5, kind: input, shape index: {}]   ;;  %s2430_s6 = inlined_call_operand.vmem [shape: f32[1,2], index: 6, kind: input, shape index: {}]   ;;  %s2431_s7 = inlined_call_operand.hbm [shape: f32[1,2], index: 7, kind: output, shape index: {0}]   ;;  %s2432_s8 = inlined_call_operand.hbm [shape: f32[1,256], index: 8, kind: output, shape index: {1}]  }
   0x1   :  { %v14_v0 = vstv %s2428_s4 }
   0x2   :  { %15 = vst [vmem:[#allocation5] sm:$0x1] %v14_v0 }
   0x3   :  { %16 = vsyncpa [#allocation7], 0 }
   0x4   :  { %18 = vsyncpa [#allocation7 + $0x1], 0 }
   0x5   :  { %19 = vsyncpa [#allocation10], 0 }
   0x6   :  { %20 = vsyncpa [#allocation8], 0 }
   0x7   :  { %21 = vsyncpa [#allocation13], 0  ;;  %s1821_s29 = smov 0   ;;  %s1823_s30 = smov 0  }
   0x8   :  { %s1825_s9 = smov 0   ;;  %s1827_s10 = smov 0  }
   0x9 LB: > { %s1840_s4 = sadd.s32 4294967295, %s1762_s10   ;;  %p47_p0 = scmp.ne.s32.totalorder %s1754_s30, %s1750_s29  ;;  %s1762_s10 = sphi %s1827_s10, %s2447_s10   ;;  %s1758_s9 = sphi %s1825_s9, %s2446_s9   ;;  %s1754_s30 = sphi %s1823_s30, %s2445_s30   ;;  %s1750_s29 = sphi %s1821_s29, %s2444_s29  }
   0xa   : > { %p48_p1 = scmp.eq.s32.totalorder %s1840_s4, 0  ;;  %p1386_p2 = scmp.ge.s32.totalorder %s1762_s10, 1 }
   0xb   : > { %p226_p3 = scmp.lt.s32.totalorder %s1762_s10, 3  ;;  %p1387_p4 = scmp.ne.s32.totalorder %s1840_s4, 0 }
   0xc   : > { %p1849_p5 = por %p48_p1, %p47_p0  ;;  %s237_s14 = sshll.u32 %s2425_s1, 4  ;;  %s238_s14 = int_to_ptr.hbm [resolvable:$true] %s237_s14 }
   0xd   : > { %p1856_p6 = pnand %p1386_p2, %p226_p3  ;;  %s1764_s16 = smov [#allocation9]  }
   0xe   : > { %s239_s17 = sshll.u32 %s1764_s16, 4  ;;  %s1865_s18 = sadd.s32 1, %s1762_s10   ;;  %s240_s17 = int_to_ptr.vmem [resolvable:$true] %s239_s17 }
   0xf   : > { %p1437_p7 = pneg %p1856_p6  ;;  %s1765_s19 = smov 256  }
  0x10   : > { %s1766_s20 = smov 16   ;;  %s31_s21 = ssub.s32 %s1762_s10, %s1865_s18 }
  0x11   : > { %p1438_p8 = pnand %p1437_p7, %p48_p1  ;;  %s34_s22 = sadd.s32 1, %s1758_s9 }
  0x12   : > { %p32_p9 = scmp.eq.s32.totalorder %s31_s21, 0  ;;  %p41_p10 = scmp.ne.s32.totalorder %s1758_s9, %s1754_s30 }
  0x13   : > { %1440 = dma.hbm_to_vmem [thread:$0]  (!%p1438_p8), %s238_s14, 8192, %s240_s17, [#allocation10], %s1765_s19, %s1765_s19, %s1766_s20  }
  0x14   : > { %p42_p11 = scmp.eq.s32.totalorder %s1762_s10, 0  ;;  %p1446_p12 = scmp.lt.s32.totalorder %s1762_s10, 2 }
  0x15   : > { %s1878_s23 = scalar_select %p32_p9, %s1758_s9, %s34_s22  }
  0x16   : > { %p43_p13 = por %p42_p11, %p41_p10  ;;  %s268_s24 = sand.u32 1, %s1758_s9  }
  0x17   : > { %s1389_s25 = sshll.u32 %s268_s24, 8  ;;  %s1422_s26 = sshll.u32 %s1762_s10, 8 }
  0x18   : > { %s278_s29 = scalar_lea.hbm %s2424_s0, %s1422_s26  ;;  %s272_s12 = scalar_lea.vmem [#allocation6], %s1389_s25 }
  0x19   : > { %s281_s13 = sshll.u32 %s272_s12, 4  ;;  %s279_s16 = sshll.u32 %s278_s29, 4  ;;  %s282_s13 = int_to_ptr.vmem [resolvable:$true] %s281_s13  ;;  %s280_s16 = int_to_ptr.hbm [resolvable:$true] %s279_s16 }
  0x1a   : > { %p1885_p0 = pnand %p1446_p12, %p43_p13  ;;  %s269_s17 = scalar_lea.sflag [#allocation7], %s268_s24 }
  0x1b   : > { %s1630_s21 = sshra.s32 %s280_s16, 4  ;;  %s1637_s26 = scalar_lea.hbm %s2424_s0, 512  ;;  %s1631_s21 = int_to_ptr.hbm [resolvable:$true] %s1630_s21 }
  0x1c   : > { %s1632_s22 = scalar_lea.hbm %s1631_s21, 256  ;;  %p1634_p3 = pneg %p1885_p0 }
  0x1d   : > { %p1633_p2 = scmp.ne.s32.totalorder %s1631_s21, %s1632_s22  ;;  %p1638_p9 = scmp.lt.s32.totalorder %s1631_s21, %s2424_s0 }
  0x1e   : > { %p1639_p10 = scmp.lt.s32.totalorder %s1637_s26, %s1632_s22 }
  0x1f   : > { %p1635_p7 = pnand %p1634_p3, %p1633_p2 }
  0x20   : > { %p1640_p11 = por %p1639_p10, %p1638_p9 }
  0x21   : > { %p1636_p8 = pneg %p1635_p7 }
  0x23   : > { %p1641_p12 = pnand %p1640_p11, %p1636_p8 }
  0x25   : > { %1644 = shalt.err (!%p1641_p12)
}
  0x26   : > { %1444 = dma.hbm_to_vmem [thread:$0]  (!%p1885_p0), %s280_s16, 4096, %s282_s13, %s269_s17, %s1765_s19, %s1765_s19, %s1766_s20  }
  0x27   : > { %293 = sbr.rel (%p1856_p6) target bundleno = 1231 (0x4cf), region = 48  ;;  %s295_s24 = sand.u32 (!%p1856_p6), 1, %s1754_s30  }
  0x28   : > { %s1394_s29 = sshll.u32 (!%p1856_p6), %s295_s24, 8  ;;  %s296_s12 = scalar_lea.sflag (!%p1856_p6), [#allocation7], %s295_s24 }
  0x29   : > { %s1905_s10 = scalar_lea.vmem (!%p1856_p6), [#allocation6], %s1394_s29 }
  0x2c   : > { %1733 = dma.done.wait (%p1849_p5), %s296_s12, 4096  }
  0x2d   : > { %1735 = vsyncadd (%p1849_p5), %s296_s12, 4294963200 }
  0x2e   : > { %1737 = dma.done.wait (%p48_p1), [#allocation10], 8192  }
  0x2f   : > { %1739 = vsyncadd (%p48_p1), [#allocation10], 4294959104  ;;  %337 = sbr.rel (%p1387_p4) target bundleno = 56 (0x38), region = 60 }
  0x34   : > { %vm338_vm0 = vcmask 0   ;;  %v341_v1 = vlaneseq  ;;  %v1767_v2 = vmov -1e+30   ;;  %v1768_v3 = vmov 0.0  }
  0x35   : > { %339 = vst.msk [vmem:[#allocation2] sm:$0x1] %vm338_vm0, %v1767_v2 }
  0x36   : > { %340 = vst.msk [vmem:[#allocation3] sm:$0x1] %vm338_vm0, %v1768_v3  ;;  %vm343_vm1 = vcmp.lt.s32.totalorder %v341_v1, 256 }
  0x37   : > { %345 = vst.msk [vmem:[#allocation4] sm:$0x3] %vm343_vm1, %v1768_v3 }
  0x38 PF: > { %v409_v4 = vld [vmem:[#allocation9 + $0xf8] sm:$0xff]  ;;  %v407_v5 = vld [vmem:[#allocation9 + $0xe8] sm:$0xff]  ;;  %v408_v17 = vld [vmem:[#allocation9 + $0xf0] sm:$0xff]  ;;  %s1413_s13 = sshll.u32 %s1840_s4, 7  ;;  %p1414_p1 = scmp.ne.s32.totalorder %s1840_s4, 1 }
  0x39   : > { %v441_v6 = vld [vmem:[#allocation9 + $0x1f8] sm:$0xff]  ;;  %578 = vmatpush.msra.mxu2 %v409_v4  ;;  %v439_v7 = vld [vmem:[#allocation9 + $0x1e8] sm:$0xff]  ;;  %448 = vmatpush.msra.mxu0 %v408_v17  ;;  %v406_v19 = vld [vmem:[#allocation9 + $0xe0] sm:$0xff]  ;;  %s1079_s16 = sshra.s32 %s1413_s13, 7 }
  0x3a   : > { %643 = vmatpush.msra.mxu3 %v441_v6  ;;  %v405_v8 = vld [vmem:[#allocation9 + $0xd8] sm:$0xff]  ;;  %v403_v10 = vld [vmem:[#allocation9 + $0xc8] sm:$0xff]  ;;  %v440_v20 = vld [vmem:[#allocation9 + $0x1f0] sm:$0xff]  ;;  %s1081_s14 = scalar_lea.vmem [#allocation12], %s1079_s16 }
  0x3b   : > { %v437_v9 = vld [vmem:[#allocation9 + $0x1d8] sm:$0xff]  ;;  %579 = vmatpush.msra.mxu2 %v407_v5  ;;  %v435_v11 = vld [vmem:[#allocation9 + $0x1c8] sm:$0xff]  ;;  %v404_v21 = vld [vmem:[#allocation9 + $0xd0] sm:$0xff]  ;;  %449 = vmatpush.msra.mxu0 %v406_v19 }
  0x3c   : > { %644 = vmatpush.msra.mxu3 %v439_v7  ;;  %v401_v12 = vld [vmem:[#allocation9 + $0xb8] sm:$0xff]  ;;  %v399_v14 = vld [vmem:[#allocation9 + $0xa8] sm:$0xff]  ;;  %v438_v22 = vld [vmem:[#allocation9 + $0x1e0] sm:$0xff]  ;;  %513 = vmatpush.msra.mxu1 %v440_v20 }
  0x3d   : > { %580 = vmatpush.msra.mxu2 %v405_v8  ;;  %v433_v13 = vld [vmem:[#allocation9 + $0x1b8] sm:$0xff]  ;;  %v431_v15 = vld [vmem:[#allocation9 + $0x1a8] sm:$0xff]  ;;  %v402_v25 = vld [vmem:[#allocation9 + $0xc0] sm:$0xff]  ;;  %450 = vmatpush.msra.mxu0 %v404_v21 }
  0x3e   : > { %645 = vmatpush.msra.mxu3 %v437_v9  ;;  %v397_v16 = vld [vmem:[#allocation9 + $0x98] sm:$0xff]  ;;  %v395_v23 = vld [vmem:[#allocation9 + $0x88] sm:$0xff]  ;;  %v436_v26 = vld [vmem:[#allocation9 + $0x1d0] sm:$0xff]  ;;  %514 = vmatpush.msra.mxu1 %v438_v22 }
  0x3f   : > { %581 = vmatpush.msra.mxu2 %v403_v10  ;;  %v429_v18 = vld [vmem:[#allocation9 + $0x198] sm:$0xff]  ;;  %v427_v24 = vld [vmem:[#allocation9 + $0x188] sm:$0xff]  ;;  %v400_v29 = vld [vmem:[#allocation9 + $0xb0] sm:$0xff]  ;;  %451 = vmatpush.msra.mxu0 %v402_v25 }
  0x40   : > { %646 = vmatpush.msra.mxu3 %v435_v11  ;;  %v393_v27 = vld [vmem:[#allocation9 + $0x78] sm:$0xff]  ;;  %v434_v30 = vld [vmem:[#allocation9 + $0x1c0] sm:$0xff]  ;;  %v391_v31 = vld [vmem:[#allocation9 + $0x68] sm:$0xff]  ;;  %515 = vmatpush.msra.mxu1 %v436_v26 }
  0x41   : > { %582 = vmatpush.msra.mxu2 %v401_v12  ;;  %v425_v28 = vld [vmem:[#allocation9 + $0x178] sm:$0xff]  ;;  %v423_v32 = vld [vmem:[#allocation9 + $0x168] sm:$0xff]  ;;  %v398_v33 = vld [vmem:[#allocation9 + $0xa0] sm:$0xff]  ;;  %452 = vmatpush.msra.mxu0 %v400_v29 }
  0x42   : > { %647 = vmatpush.msra.mxu3 %v433_v13  ;;  %v432_v34 = vld [vmem:[#allocation9 + $0x1b0] sm:$0xff]  ;;  %v389_v35 = vld [vmem:[#allocation9 + $0x58] sm:$0xff]  ;;  %516 = vmatpush.msra.mxu1 %v434_v30  ;;  %v430_v38 = vld [vmem:[#allocation9 + $0x1a0] sm:$0xff] }
  0x43   : > { %583 = vmatpush.msra.mxu2 %v399_v14  ;;  %v421_v36 = vld [vmem:[#allocation9 + $0x158] sm:$0xff]  ;;  %v396_v37 = vld [vmem:[#allocation9 + $0x90] sm:$0xff]  ;;  %v387_v39 = vld [vmem:[#allocation9 + $0x48] sm:$0xff]  ;;  %453 = vmatpush.msra.mxu0 %v398_v33 }
  0x44   : > { %648 = vmatpush.msra.mxu3 %v431_v15  ;;  %v419_v40 = vld [vmem:[#allocation9 + $0x148] sm:$0xff]  ;;  %517 = vmatpush.msra.mxu1 %v432_v34  ;;  %v394_v41 = vld [vmem:[#allocation9 + $0x80] sm:$0xff]  ;;  %v428_v42 = vld [vmem:[#allocation9 + $0x190] sm:$0xff] }
  0x45   : > { %584 = vmatpush.msra.mxu2 %v397_v16  ;;  %v385_v43 = vld [vmem:[#allocation9 + $0x38] sm:$0xff]  ;;  %454 = vmatpush.msra.mxu0 %v396_v37  ;;  %v392_v45 = vld [vmem:[#allocation9 + $0x70] sm:$0xff]  ;;  %v426_v46 = vld [vmem:[#allocation9 + $0x180] sm:$0xff] }
  0x46   : > { %649 = vmatpush.msra.mxu3 %v429_v18  ;;  %v417_v44 = vld [vmem:[#allocation9 + $0x138] sm:$0xff]  ;;  %518 = vmatpush.msra.mxu1 %v430_v38  ;;  %v383_v47 = vld [vmem:[#allocation9 + $0x28] sm:$0xff]  ;;  %v390_v49 = vld [vmem:[#allocation9 + $0x60] sm:$0xff] }
  0x47   : > { %585 = vmatpush.msra.mxu2 %v395_v23  ;;  %v415_v48 = vld [vmem:[#allocation9 + $0x128] sm:$0xff]  ;;  %455 = vmatpush.msra.mxu0 %v394_v41  ;;  %v424_v50 = vld [vmem:[#allocation9 + $0x170] sm:$0xff]  ;;  %v381_v51 = vld [vmem:[#allocation9 + $0x18] sm:$0xff] }
  0x48   : > { %650 = vmatpush.msra.mxu3 %v427_v24  ;;  %519 = vmatpush.msra.mxu1 %v428_v42  ;;  %v413_v52 = vld [vmem:[#allocation9 + $0x118] sm:$0xff]  ;;  %v388_v53 = vld [vmem:[#allocation9 + $0x50] sm:$0xff]  ;;  %v422_v54 = vld [vmem:[#allocation9 + $0x160] sm:$0xff] }
  0x49   : > { %586 = vmatpush.msra.mxu2 %v393_v27  ;;  %456 = vmatpush.msra.mxu0 %v392_v45  ;;  %v379_v55 = vld [vmem:[#allocation9 + $0x8] sm:$0xff]  ;;  %v1918_v57 = vld [vmem:[%s1905_s10] sm:$0xff]  ;;  %v420_v60 = vld [vmem:[#allocation9 + $0x150] sm:$0xff] }
  0x4a   : > { %651 = vmatpush.msra.mxu3 %v425_v28  ;;  %520 = vmatpush.msra.mxu1 %v426_v46  ;;  %v411_v56 = vld [vmem:[#allocation9 + $0x108] sm:$0xff]  ;;  %v386_v59 = vld [vmem:[#allocation9 + $0x40] sm:$0xff]  ;;  %v384_v61 = vld [vmem:[#allocation9 + $0x30] sm:$0xff] }
  0x4b   : > { %587 = vmatpush.msra.mxu2 %v391_v31  ;;  %457 = vmatpush.msra.mxu0 %v390_v49  ;;  %v1921_v58 = vld [vmem:[%s1905_s10 + $0x8] sm:$0xff]  ;;  %v418_v62 = vld [vmem:[#allocation9 + $0x140] sm:$0xff]  ;;  %v416_v0 = vld [vmem:[#allocation9 + $0x130] sm:$0xff] }
  0x4c   : > { %652 = vmatpush.msra.mxu3 %v423_v32  ;;  %521 = vmatpush.msra.mxu1 %v424_v50  ;;  %v382_v63 = vld [vmem:[#allocation9 + $0x20] sm:$0xff]  ;;  %v380_v1 = vld [vmem:[#allocation9 + $0x10] sm:$0xff]  ;;  %v1929_v4 = vld [vmem:[%s1905_s10 + $0x18] sm:$0xff] }
  0x4d   : > { %588 = vmatpush.msra.mxu2 %v389_v35  ;;  %458 = vmatpush.msra.mxu0 %v388_v53  ;;  %v414_v2 = vld [vmem:[#allocation9 + $0x120] sm:$0xff]  ;;  %v1926_v3 = vld [vmem:[%s1905_s10 + $0x10] sm:$0xff]  ;;  %v1939_v9 = vld [vmem:[%s1905_s10 + $0x28] sm:$0xff] }
  0x4e   : > { %653 = vmatpush.msra.mxu3 %v421_v36  ;;  %522 = vmatpush.msra.mxu1 %v422_v54  ;;  %v378_v5 = vld [vmem:[#allocation9] sm:$0xff]  ;;  %v412_v6 = vld [vmem:[#allocation9 + $0x110] sm:$0xff]  ;;  %v1949_v11 = vld [vmem:[%s1905_s10 + $0x38] sm:$0xff] }
  0x4f   : > { %589 = vmatpush.msra.mxu2 %v387_v39  ;;  %459 = vmatpush.msra.mxu0 %v386_v59  ;;  %v410_v7 = vld [vmem:[#allocation9 + $0x100] sm:$0xff]  ;;  %v1946_v10 = vld [vmem:[%s1905_s10 + $0x30] sm:$0xff]  ;;  %v1959_v13 = vld [vmem:[%s1905_s10 + $0x48] sm:$0xff] }
  0x50   : > { %654 = vmatpush.msra.mxu3 %v419_v40  ;;  %523 = vmatpush.msra.mxu1 %v420_v60  ;;  %v1936_v8 = vld [vmem:[%s1905_s10 + $0x20] sm:$0xff]  ;;  %v1966_v14 = vld [vmem:[%s1905_s10 + $0x50] sm:$0xff]  ;;  %v1969_v15 = vld [vmem:[%s1905_s10 + $0x58] sm:$0xff] }
  0x51   : > { %590 = vmatpush.msra.mxu2 %v385_v43  ;;  %460 = vmatpush.msra.mxu0 %v384_v61  ;;  %v1956_v12 = vld [vmem:[%s1905_s10 + $0x40] sm:$0xff]  ;;  %v1977_v17 = vld [vmem:[%s1905_s10 + $0x68] sm:$0xff]  ;;  %v360_v18 = vld [vmem:[%s1905_s10 + $0x70] sm:$0xff] }
  0x52   : > { %655 = vmatpush.msra.mxu3 %v417_v44  ;;  %524 = vmatpush.msra.mxu1 %v418_v62  ;;  %v358_v16 = vld [vmem:[%s1905_s10 + $0x60] sm:$0xff]  ;;  %v361_v19 = vld [vmem:[%s1905_s10 + $0x78] sm:$0xff]  ;;  %v363_v21 = vld [vmem:[%s1905_s10 + $0x88] sm:$0xff] }
  0x53   : > { %591 = vmatpush.msra.mxu2 %v383_v47  ;;  %461 = vmatpush.msra.mxu0 %v382_v63  ;;  %v362_v20 = vld [vmem:[%s1905_s10 + $0x80] sm:$0xff]  ;;  %v364_v22 = vld [vmem:[%s1905_s10 + $0x90] sm:$0xff]  ;;  %v365_v23 = vld [vmem:[%s1905_s10 + $0x98] sm:$0xff] }
  0x54   : > { %656 = vmatpush.msra.mxu3 %v415_v48  ;;  %525 = vmatpush.msra.mxu1 %v416_v0  ;;  %v366_v24 = vld [vmem:[%s1905_s10 + $0xa0] sm:$0xff]  ;;  %v367_v25 = vld [vmem:[%s1905_s10 + $0xa8] sm:$0xff]  ;;  %v1992_v26 = vld [vmem:[%s1905_s10 + $0xf0] sm:$0xff] }
  0x55   : > { %592 = vmatpush.msra.mxu2 %v381_v51  ;;  %462 = vmatpush.msra.mxu0 %v380_v1  ;;  %v374_v27 = vld [vmem:[%s1905_s10 + $0xe0] sm:$0xff]  ;;  %v372_v28 = vld [vmem:[%s1905_s10 + $0xd0] sm:$0xff]  ;;  %v369_v30 = vld [vmem:[%s1905_s10 + $0xb8] sm:$0xff] }
  0x56   : > { %657 = vmatpush.msra.mxu3 %v413_v52  ;;  %526 = vmatpush.msra.mxu1 %v414_v2  ;;  %v368_v29 = vld [vmem:[%s1905_s10 + $0xb0] sm:$0xff]  ;;  %v370_v31 = vld [vmem:[%s1905_s10 + $0xc0] sm:$0xff]  ;;  %v377_v32 = vld [vmem:[%s1905_s10 + $0xf8] sm:$0xff] }
  0x57   : > { %593 = vmatpush.msra.mxu2 %v379_v55  ;;  %463 = vmatpush.msra.mxu0 %v378_v5  ;;  %v375_v33 = vld [vmem:[%s1905_s10 + $0xe8] sm:$0xff]  ;;  %v373_v34 = vld [vmem:[%s1905_s10 + $0xd8] sm:$0xff] }
  0x58   : > { %658 = vmatpush.msra.mxu3 %v411_v56  ;;  %594 = vmatmul.f32.vlgmr.msra.gmra.mxu2 %v1918_v57  ;;  %v371_v35 = vld [vmem:[%s1905_s10 + $0xc8] sm:$0xff]  ;;  %v442_v36 = vld [vmem:[%s2426_s2] sm:$0x3] }
  0x59   : > { %659 = vmatmul.f32.vlgmr.msra.gmra.mxu3 %v1921_v58  ;;  %527 = vmatpush.msra.mxu1 %v412_v6  ;;  %v2021_v37 = vperm.slane %v442_v36, 1  ;;  %v2025_v41 = vperm.slane %v442_v36, 0 }
  0x5a   : > { %464 = vmatmul.f32.vlgmr.msra.gmra.mxu0 %v1918_v57  ;;  %1141 = vmatpush.msrb.mxu2 %v377_v32 }
  0x5b   : > { %528 = vmatpush.msra.mxu1 %v410_v7 }
  0x5c   : > { %529 = vmatmul.f32.vlgmr.msra.gmra.mxu1 %v1921_v58  ;;  %1142 = vmatpush.msrb.mxu2 %v375_v33 }
  0x5d   : > { %1121 = vmatpush.msrb.mxu1 %v1992_v26 }
  0x5e   : > { %1143 = vmatpush.msrb.mxu2 %v373_v34 }
  0x5f   : > { %1122 = vmatpush.msrb.mxu1 %v374_v27 }
  0x60   : > { %597 = vmatmul.f32.gmra.mxu2 %v1926_v3 }
  0x61   : > { %662 = vmatmul.f32.gmra.mxu3 %v1929_v4  ;;  %1123 = vmatpush.msrb.mxu1 %v372_v28 }
  0x62   : > { %467 = vmatmul.f32.gmra.mxu0 %v1926_v3  ;;  %1144 = vmatpush.msrb.mxu2 %v371_v35 }
  0x63   : > { %1124 = vmatpush.msrb.mxu1 %v370_v31 }
  0x64   : > { %532 = vmatmul.f32.gmra.mxu1 %v1929_v4  ;;  %1145 = vmatpush.msrb.mxu2 %v369_v30 }
  0x65   : > { %1125 = vmatpush.msrb.mxu1 %v368_v29 }
  0x66   : > { %1146 = vmatpush.msrb.mxu2 %v367_v25 }
  0x67   : > { %1126 = vmatpush.msrb.mxu1 %v366_v24 }
  0x68   : > { %600 = vmatmul.f32.gmra.mxu2 %v1936_v8 }
  0x69   : > { %665 = vmatmul.f32.gmra.mxu3 %v1939_v9  ;;  %1127 = vmatpush.msrb.mxu1 %v364_v22 }
  0x6a   : > { %470 = vmatmul.f32.gmra.mxu0 %v1936_v8  ;;  %1147 = vmatpush.msrb.mxu2 %v365_v23 }
  0x6b   : > { %1128 = vmatpush.msrb.mxu1 %v362_v20 }
  0x6c   : > { %535 = vmatmul.f32.gmra.mxu1 %v1939_v9  ;;  %1148 = vmatpush.msrb.mxu2 %v363_v21 }
  0x6d   : > { %1129 = vmatpush.msrb.mxu1 %v360_v18 }
  0x6e   : > { %1149 = vmatpush.msrb.mxu2 %v361_v19 }
  0x6f   : > { %1130 = vmatpush.msrb.mxu1 %v358_v16 }
  0x70   : > { %603 = vmatmul.f32.gmra.mxu2 %v1946_v10 }
  0x71   : > { %668 = vmatmul.f32.gmra.mxu3 %v1949_v11  ;;  %1131 = vmatpush.msrb.mxu1 %v1966_v14 }
  0x72   : > { %473 = vmatmul.f32.gmra.mxu0 %v1946_v10  ;;  %1150 = vmatpush.msrb.mxu2 %v1977_v17 }
  0x73   : > { %1132 = vmatpush.msrb.mxu1 %v1956_v12 }
  0x74   : > { %538 = vmatmul.f32.gmra.mxu1 %v1949_v11  ;;  %1151 = vmatpush.msrb.mxu2 %v1969_v15 }
  0x75   : > { %1133 = vmatpush.msrb.mxu1 %v1946_v10 }
  0x76   : > { %1152 = vmatpush.msrb.mxu2 %v1959_v13 }
  0x77   : > { %1134 = vmatpush.msrb.mxu1 %v1936_v8 }
  0x78   : > { %606 = vmatmul.f32.gmra.mxu2 %v1956_v12 }
  0x79   : > { %671 = vmatmul.f32.gmra.mxu3 %v1959_v13  ;;  %1135 = vmatpush.msrb.mxu1 %v1926_v3 }
  0x7a   : > { %476 = vmatmul.f32.gmra.mxu0 %v1956_v12  ;;  %1153 = vmatpush.msrb.mxu2 %v1949_v11 }
  0x7b   : > { %1136 = vmatpush.msrb.mxu1 %v1918_v57 }
  0x7c   : > { %541 = vmatmul.f32.gmra.mxu1 %v1959_v13  ;;  %1154 = vmatpush.msrb.mxu2 %v1939_v9 }
  0x7e   : > { %1155 = vmatpush.msrb.mxu2 %v1929_v4 }
  0x80   : > { %609 = vmatmul.f32.gmra.mxu2 %v1966_v14 }
  0x81   : > { %674 = vmatmul.f32.gmra.mxu3 %v1969_v15  ;;  %1156 = vmatpush.msrb.mxu2 %v1921_v58 }
  0x82   : > { %479 = vmatmul.f32.gmra.mxu0 %v1966_v14 }
  0x84   : > { %544 = vmatmul.f32.gmra.mxu1 %v1969_v15 }
  0x88   : > { %612 = vmatmul.f32.gmra.mxu2 %v358_v16 }
  0x89   : > { %677 = vmatmul.f32.gmra.mxu3 %v1977_v17 }
  0x8a   : > { %482 = vmatmul.f32.gmra.mxu0 %v358_v16 }
  0x8c   : > { %547 = vmatmul.f32.gmra.mxu1 %v1977_v17 }
  0x90   : > { %615 = vmatmul.f32.gmra.mxu2 %v360_v18 }
  0x91   : > { %680 = vmatmul.f32.gmra.mxu3 %v361_v19 }
  0x92   : > { %485 = vmatmul.f32.gmra.mxu0 %v360_v18 }
  0x94   : > { %550 = vmatmul.f32.gmra.mxu1 %v361_v19 }
  0x98   : > { %618 = vmatmul.f32.gmra.mxu2 %v362_v20 }
  0x99   : > { %683 = vmatmul.f32.gmra.mxu3 %v363_v21 }
  0x9a   : > { %488 = vmatmul.f32.gmra.mxu0 %v362_v20 }
  0x9c   : > { %553 = vmatmul.f32.gmra.mxu1 %v363_v21 }
  0xa0   : > { %621 = vmatmul.f32.gmra.mxu2 %v364_v22 }
  0xa1   : > { %686 = vmatmul.f32.gmra.mxu3 %v365_v23 }
  0xa2   : > { %491 = vmatmul.f32.gmra.mxu0 %v364_v22 }
  0xa4   : > { %556 = vmatmul.f32.gmra.mxu1 %v365_v23 }
  0xa8   : > { %624 = vmatmul.f32.gmra.mxu2 %v366_v24 }
  0xa9   : > { %689 = vmatmul.f32.gmra.mxu3 %v367_v25 }
  0xaa   : > { %494 = vmatmul.f32.gmra.mxu0 %v366_v24 }
  0xac   : > { %559 = vmatmul.f32.gmra.mxu1 %v367_v25 }
  0xb0   : > { %627 = vmatmul.f32.gmra.mxu2 %v368_v29 }
  0xb1   : > { %692 = vmatmul.f32.gmra.mxu3 %v369_v30 }
  0xb2   : > { %497 = vmatmul.f32.gmra.mxu0 %v368_v29 }
  0xb4   : > { %562 = vmatmul.f32.gmra.mxu1 %v369_v30 }
  0xb8   : > { %630 = vmatmul.f32.gmra.mxu2 %v370_v31 }
  0xb9   : > { %695 = vmatmul.f32.gmra.mxu3 %v371_v35 }
  0xba   : > { %500 = vmatmul.f32.gmra.mxu0 %v370_v31 }
  0xbc   : > { %565 = vmatmul.f32.gmra.mxu1 %v371_v35 }
  0xc0   : > { %633 = vmatmul.f32.gmra.mxu2 %v372_v28 }
  0xc1   : > { %698 = vmatmul.f32.gmra.mxu3 %v373_v34 }
  0xc2   : > { %503 = vmatmul.f32.gmra.mxu0 %v372_v28 }
  0xc4   : > { %568 = vmatmul.f32.gmra.mxu1 %v373_v34 }
  0xc8   : > { %636 = vmatmul.f32.gmra.mxu2 %v374_v27 }
  0xc9   : > { %701 = vmatmul.f32.gmra.mxu3 %v375_v33 }
  0xca   : > { %506 = vmatmul.f32.gmra.mxu0 %v374_v27 }
  0xcc   : > { %571 = vmatmul.f32.gmra.mxu1 %v375_v33 }
  0xd0   : > { %639 = vmatmul.f32.gmra.mxu2 %v1992_v26 }
  0xd1   : > { %704 = vmatmul.f32.gmra.mxu3 %v377_v32 }
  0xd2   : > { %509 = vmatmul.f32.gmra.mxu0 %v1992_v26 }
  0xd4   : > { %574 = vmatmul.f32.gmra.mxu1 %v377_v32 }
  0xd7   : > { %v465_v43 = vpop.f32.mrf.mxu0 }
  0xd8   : > { %v466_v45 = vadd.f32 %v465_v43, %v2025_v41 }
  0xd9   : > { %v530_v46 = vpop.f32.mrf.mxu1 }
  0xda   : > { %v531_v47 = vadd.f32 %v530_v46, %v466_v45 }
  0xdb   : > { %v595_v38 = vpop.f32.mrf.mxu2 }
  0xdc   : > { %v660_v39 = vpop.f32.mrf.mxu3  ;;  %v596_v40 = vadd.f32 %v595_v38, %v2021_v37 }
  0xde   : > { %v661_v42 = vadd.f32 %v660_v39, %v596_v40 }
  0xdf   : > { %v468_v52 = vpop.f32.mrf.mxu0 }
  0xe0   : > { %v1397_v44 = vmul.f32 -1.442695, %v661_v42  ;;  %v469_v55 = vadd.f32 %v468_v52, %v2025_v41 }
  0xe1   : > { %v533_v57 = vpop.f32.mrf.mxu1 }
  0xe2   : > { %1495 = vpow2.f32 %v1397_v44  ;;  %v534_v58 = vadd.f32 %v533_v57, %v469_v55 }
  0xe3   : > { %v598_v48 = vpop.f32.mrf.mxu2 }
  0xe4   : > { %v663_v49 = vpop.f32.mrf.mxu3  ;;  %v599_v50 = vadd.f32 %v598_v48, %v2021_v37 }
  0xe6   : > { %v664_v51 = vadd.f32 %v663_v49, %v599_v50 }
  0xe7   : > { %v471_v63 = vpop.f32.mrf.mxu0 }
  0xe8   : > { %v1496_v53 = vpop.eup %1495  ;;  %v1398_v54 = vmul.f32 -1.442695, %v664_v51  ;;  %v472_v2 = vadd.f32 %v471_v63, %v2025_v41 }
  0xe9   : > { %v772_v56 = vadd.f32 1.0, %v1496_v53  ;;  %v536_v5 = vpop.f32.mrf.mxu1 }
  0xea   : > { %1497 = vpow2.f32 %v1398_v54  ;;  %v2034_v6 = vadd.f32 %v536_v5, %v472_v2 }
  0xeb   : > { %1499 = vrcp.f32 %v772_v56  ;;  %v601_v59 = vpop.f32.mrf.mxu2  ;;  %v797_v15 = vand.u32 2147483647, %v772_v56  ;;  %v799_v16 = vand.u32 2147483648, %v772_v56  ;;  %vm793_vm3 = vweird.f32 %v772_v56 }
  0xec   : > { %v666_v60 = vpop.f32.mrf.mxu3  ;;  %v602_v61 = vadd.f32 %v601_v59, %v2021_v37 }
  0xed   : > { %v800_v29 = vor.u32 1.1754944e-38, %v799_v16  ;;  %vm798_vm5 = vcmp.eq.f32.partialorder %v797_v15, 8.507059e+37 }
  0xee   : > { %v667_v62 = vadd.f32 %v666_v60, %v602_v61 }
  0xef   : > { %v474_v14 = vpop.f32.mrf.mxu0 }
  0xf0   : > { %v1498_v0 = vpop.eup %1497  ;;  %v1399_v1 = vmul.f32 -1.442695, %v667_v62  ;;  %v475_v19 = vadd.f32 %v474_v14, %v2025_v41 }
  0xf1   : > { %v1500_v3 = vpop.eup %1499  ;;  %v2032_v4 = vadd.f32 1.0, %v1498_v0  ;;  %v539_v23 = vpop.f32.mrf.mxu1 }
  0xf2   : > { %1501 = vpow2.f32 %v1399_v1  ;;  %v789_v7 = vmul.f32 %v1500_v3, %v772_v56  ;;  %vm794_vm2 = vweird.f32 %v1500_v3  ;;  %v2041_v24 = vadd.f32 %v539_v23, %v475_v19 }
  0xf3   : > { %1503 = vrcp.f32 %v2032_v4  ;;  %v604_v8 = vpop.f32.mrf.mxu2  ;;  %vm795_vm4 = vmor %vm793_vm3, %vm794_vm2  ;;  %v812_v39 = vand.u32 2147483647, %v2032_v4  ;;  %v814_v40 = vand.u32 2147483648, %v2032_v4  ;;  %vm808_vm7 = vweird.f32 %v2032_v4 }
  0xf4   : > { %v669_v9 = vpop.f32.mrf.mxu3  ;;  %v605_v10 = vadd.f32 %v604_v8, %v2021_v37  ;;  %v790_v11 = vsub.f32 1.0, %v789_v7  ;;  %1505 = vtanh.f32 %v531_v47 }
  0xf5   : > { %v815_v54 = vor.u32 1.1754944e-38, %v814_v40  ;;  %vm813_vm9 = vcmp.eq.f32.partialorder %v812_v39, 8.507059e+37 }
  0xf6   : > { %v670_v12 = vadd.f32 %v669_v9, %v605_v10  ;;  %v791_v13 = vmul.f32 %v1500_v3, %v790_v11 }
  0xf7   : > { %v477_v38 = vpop.f32.mrf.mxu0 }
  0xf8   : > { %v1502_v17 = vpop.eup %1501  ;;  %v1400_v18 = vmul.f32 -1.442695, %v670_v12  ;;  %v792_v20 = vadd.f32 %v1500_v3, %v791_v13  ;;  %v478_v44 = vadd.f32 %v477_v38, %v2025_v41 }
  0xf9   : > { %v1504_v21 = vpop.eup %1503  ;;  %v2039_v22 = vadd.f32 1.0, %v1502_v17  ;;  %v542_v48 = vpop.f32.mrf.mxu1 }
  0xfa   : > { %1507 = vpow2.f32 %v1400_v18  ;;  %v804_v25 = vmul.f32 %v1504_v21, %v2032_v4  ;;  %v1506_v26 = vpop.eup %1505  ;;  %v796_v32 = vsel %vm795_vm4, %v1500_v3, %v792_v20  ;;  %vm809_vm6 = vweird.f32 %v1504_v21 }
  0xfb   : > { %1509 = vrcp.f32 %v2039_v22  ;;  %v607_v27 = vpop.f32.mrf.mxu2  ;;  %v801_v33 = vsel %vm798_vm5, %v800_v29, %v796_v32  ;;  %v2053_v49 = vadd.f32 %v542_v48, %v478_v44  ;;  %vm810_vm8 = vmor %vm808_vm7, %vm809_vm6  ;;  %v827_v63 = vand.u32 2147483647, %v2039_v22 }
  0xfc   : > { %v672_v28 = vpop.f32.mrf.mxu3  ;;  %v608_v30 = vadd.f32 %v607_v27, %v2021_v37  ;;  %v805_v31 = vsub.f32 1.0, %v804_v25  ;;  %1511 = vtanh.f32 %v534_v58  ;;  %v2046_v36 = vmul.f32 %v1506_v26, %v801_v33 }
  0xfd   : > { %v829_v0 = vand.u32 2147483648, %v2039_v22  ;;  %vm823_vm11 = vweird.f32 %v2039_v22  ;;  %vm828_vm13 = vcmp.eq.f32.partialorder %v827_v63, 8.507059e+37 }
  0xfe   : > { %v673_v34 = vadd.f32 %v672_v28, %v608_v30  ;;  %v806_v35 = vmul.f32 %v1504_v21, %v805_v31 }
  0xff   : > { %v480_v62 = vpop.f32.mrf.mxu0  ;;  %v830_v13 = vor.u32 1.1754944e-38, %v829_v0 }
 0x100   : > { %v1508_v42 = vpop.eup %1507  ;;  %v1401_v43 = vmul.f32 -1.442695, %v673_v34  ;;  %v807_v45 = vadd.f32 %v1504_v21, %v806_v35  ;;  %v481_v3 = vadd.f32 %v480_v62, %v2025_v41 }
 0x101   : > { %v1510_v46 = vpop.eup %1509  ;;  %v2051_v47 = vadd.f32 1.0, %v1508_v42 }
 0x102   : > { %1513 = vpow2.f32 %v1401_v43  ;;  %v819_v50 = vmul.f32 %v1510_v46, %v2039_v22  ;;  %v1512_v51 = vpop.eup %1511  ;;  %v811_v57 = vsel %vm810_vm8, %v1504_v21, %v807_v45  ;;  %vm824_vm10 = vweird.f32 %v1510_v46 }
 0x103   : > { %1515 = vrcp.f32 %v2051_v47  ;;  %v610_v52 = vpop.f32.mrf.mxu2  ;;  %v816_v58 = vsel %vm813_vm9, %v815_v54, %v811_v57  ;;  %vm825_vm12 = vmor %vm823_vm11, %vm824_vm10  ;;  %v842_v22 = vand.u32 2147483647, %v2051_v47  ;;  %v844_v23 = vand.u32 2147483648, %v2051_v47 }
 0x104   : > { %v675_v53 = vpop.f32.mrf.mxu3  ;;  %v611_v55 = vadd.f32 %v610_v52, %v2021_v37  ;;  %v820_v56 = vsub.f32 1.0, %v819_v50  ;;  %1517 = vtanh.f32 %v2034_v6  ;;  %v2060_v61 = vmul.f32 %v1512_v51, %v816_v58  ;;  %v545_v6 = vpop.f32.mrf.mxu1 }
 0x105   : > { %v2067_v8 = vadd.f32 %v545_v6, %v481_v3  ;;  %vm838_vm15 = vweird.f32 %v2051_v47  ;;  %v845_v38 = vor.u32 1.1754944e-38, %v844_v23  ;;  %vm843_vm1 = vcmp.eq.f32.partialorder %v842_v22, 8.507059e+37 }
 0x106   : > { %v676_v59 = vadd.f32 %v675_v53, %v611_v55  ;;  %v821_v60 = vmul.f32 %v1510_v46, %v820_v56 }
 0x107   : > { %v483_v21 = vpop.f32.mrf.mxu0 }
 0x108   : > { %v1514_v1 = vpop.eup %1513  ;;  %v1402_v2 = vmul.f32 -1.442695, %v676_v59  ;;  %v822_v4 = vadd.f32 %v1510_v46, %v821_v60  ;;  %v484_v27 = vadd.f32 %v483_v21, %v2025_v41 }
 0x109   : > { %v1516_v5 = vpop.eup %1515  ;;  %v2065_v7 = vadd.f32 1.0, %v1514_v1 }
 0x10a   : > { %1519 = vpow2.f32 %v1402_v2  ;;  %v834_v9 = vmul.f32 %v1516_v5, %v2051_v47  ;;  %v1518_v10 = vpop.eup %1517  ;;  %v826_v16 = vsel %vm825_vm12, %v1510_v46, %v822_v4  ;;  %vm839_vm14 = vweird.f32 %v1516_v5 }
 0x10b   : > { %1521 = vrcp.f32 %v2065_v7  ;;  %v613_v11 = vpop.f32.mrf.mxu2  ;;  %v831_v17 = vsel %vm828_vm13, %v830_v13, %v826_v16  ;;  %vm840_vm0 = vmor %vm838_vm15, %vm839_vm14  ;;  %v857_v48 = vand.u32 2147483647, %v2065_v7  ;;  %v859_v50 = vand.u32 2147483648, %v2065_v7 }
 0x10c   : > { %v678_v12 = vpop.f32.mrf.mxu3  ;;  %v614_v14 = vadd.f32 %v613_v11, %v2021_v37  ;;  %v835_v15 = vsub.f32 1.0, %v834_v9  ;;  %1523 = vtanh.f32 %v2041_v24  ;;  %v2074_v20 = vmul.f32 %v1518_v10, %v831_v17  ;;  %v548_v24 = vpop.f32.mrf.mxu1 }
 0x10d   : > { %v2081_v31 = vadd.f32 %v548_v24, %v484_v27  ;;  %vm853_vm3 = vweird.f32 %v2065_v7  ;;  %v860_v63 = vor.u32 1.1754944e-38, %v859_v50  ;;  %vm858_vm5 = vcmp.eq.f32.partialorder %v857_v48, 8.507059e+37 }
 0x10e   : > { %v679_v18 = vadd.f32 %v678_v12, %v614_v14  ;;  %v836_v19 = vmul.f32 %v1516_v5, %v835_v15 }
 0x10f   : > { %v486_v47 = vpop.f32.mrf.mxu0 }
 0x110   : > { %v1520_v25 = vpop.eup %1519  ;;  %v1403_v26 = vmul.f32 -1.442695, %v679_v18  ;;  %v837_v28 = vadd.f32 %v1516_v5, %v836_v19  ;;  %v487_v53 = vadd.f32 %v486_v47, %v2025_v41 }
 0x111   : > { %v1522_v29 = vpop.eup %1521  ;;  %v2079_v30 = vadd.f32 1.0, %v1520_v25 }
 0x112   : > { %1525 = vpow2.f32 %v1403_v26  ;;  %v849_v32 = vmul.f32 %v1522_v29, %v2065_v7  ;;  %v1524_v33 = vpop.eup %1523  ;;  %v841_v42 = vsel %vm840_vm0, %v1516_v5, %v837_v28  ;;  %vm854_vm2 = vweird.f32 %v1522_v29 }
 0x113   : > { %1527 = vrcp.f32 %v2079_v30  ;;  %v616_v34 = vpop.f32.mrf.mxu2  ;;  %v846_v43 = vsel %vm843_vm1, %v845_v38, %v841_v42  ;;  %vm855_vm4 = vmor %vm853_vm3, %vm854_vm2  ;;  %v872_v9 = vand.u32 2147483647, %v2079_v30  ;;  %v874_v10 = vand.u32 2147483648, %v2079_v30 }
 0x114   : > { %v681_v35 = vpop.f32.mrf.mxu3  ;;  %v617_v39 = vadd.f32 %v616_v34, %v2021_v37  ;;  %v850_v40 = vsub.f32 1.0, %v849_v32  ;;  %1529 = vtanh.f32 %v2053_v49  ;;  %v2088_v46 = vmul.f32 %v1524_v33, %v846_v43  ;;  %v551_v49 = vpop.f32.mrf.mxu1 }
 0x115   : > { %v2095_v57 = vadd.f32 %v551_v49, %v487_v53  ;;  %vm868_vm7 = vweird.f32 %v2079_v30  ;;  %v875_v23 = vor.u32 1.1754944e-38, %v874_v10  ;;  %vm873_vm9 = vcmp.eq.f32.partialorder %v872_v9, 8.507059e+37 }
 0x116   : > { %v682_v44 = vadd.f32 %v681_v35, %v617_v39  ;;  %v851_v45 = vmul.f32 %v1522_v29, %v850_v40 }
 0x117   : > { %v489_v7 = vpop.f32.mrf.mxu0 }
 0x118   : > { %v1526_v51 = vpop.eup %1525  ;;  %v1404_v52 = vmul.f32 -1.442695, %v682_v44  ;;  %v852_v54 = vadd.f32 %v1522_v29, %v851_v45  ;;  %v490_v13 = vadd.f32 %v489_v7, %v2025_v41 }
 0x119   : > { %v1528_v55 = vpop.eup %1527  ;;  %v2093_v56 = vadd.f32 1.0, %v1526_v51 }
 0x11a   : > { %1531 = vpow2.f32 %v1404_v52  ;;  %v864_v58 = vmul.f32 %v1528_v55, %v2079_v30  ;;  %v1530_v59 = vpop.eup %1529  ;;  %v856_v2 = vsel %vm855_vm4, %v1522_v29, %v852_v54  ;;  %vm869_vm6 = vweird.f32 %v1528_v55 }
 0x11b   : > { %1533 = vrcp.f32 %v2093_v56  ;;  %v619_v60 = vpop.f32.mrf.mxu2  ;;  %v861_v3 = vsel %vm858_vm5, %v860_v63, %v856_v2  ;;  %vm870_vm8 = vmor %vm868_vm7, %vm869_vm6  ;;  %v887_v33 = vand.u32 2147483647, %v2093_v56  ;;  %v889_v34 = vand.u32 2147483648, %v2093_v56 }
 0x11c   : > { %v684_v62 = vpop.f32.mrf.mxu3  ;;  %v620_v0 = vadd.f32 %v619_v60, %v2021_v37  ;;  %v865_v1 = vsub.f32 1.0, %v864_v58  ;;  %1535 = vtanh.f32 %v2067_v8  ;;  %v2102_v6 = vmul.f32 %v1530_v59, %v861_v3  ;;  %v554_v8 = vpop.f32.mrf.mxu1 }
 0x11d   : > { %v2109_v17 = vadd.f32 %v554_v8, %v490_v13  ;;  %vm883_vm11 = vweird.f32 %v2093_v56  ;;  %v890_v51 = vor.u32 1.1754944e-38, %v889_v34  ;;  %vm888_vm13 = vcmp.eq.f32.partialorder %v887_v33, 8.507059e+37 }
 0x11e   : > { %v685_v4 = vadd.f32 %v684_v62, %v620_v0  ;;  %v866_v5 = vmul.f32 %v1528_v55, %v865_v1 }
 0x11f   : > { %v492_v30 = vpop.f32.mrf.mxu0 }
 0x120   : > { %v1532_v11 = vpop.eup %1531  ;;  %v1405_v12 = vmul.f32 -1.442695, %v685_v4  ;;  %v867_v14 = vadd.f32 %v1528_v55, %v866_v5  ;;  %v493_v39 = vadd.f32 %v492_v30, %v2025_v41 }
 0x121   : > { %v1534_v15 = vpop.eup %1533  ;;  %v2107_v16 = vadd.f32 1.0, %v1532_v11 }
 0x122   : > { %1537 = vpow2.f32 %v1405_v12  ;;  %v879_v18 = vmul.f32 %v1534_v15, %v2093_v56  ;;  %v1536_v19 = vpop.eup %1535  ;;  %v871_v27 = vsel %vm870_vm8, %v1528_v55, %v867_v14  ;;  %vm884_vm10 = vweird.f32 %v1534_v15 }
 0x123   : > { %1539 = vrcp.f32 %v2107_v16  ;;  %v622_v21 = vpop.f32.mrf.mxu2  ;;  %v876_v28 = vsel %vm873_vm9, %v875_v23, %v871_v27  ;;  %vm885_vm12 = vmor %vm883_vm11, %vm884_vm10  ;;  %v904_v56 = vand.u32 2147483648, %v2107_v16  ;;  %v902_v62 = vand.u32 2147483647, %v2107_v16 }
 0x124   : > { %v687_v22 = vpop.f32.mrf.mxu3  ;;  %v623_v25 = vadd.f32 %v622_v21, %v2021_v37  ;;  %v880_v26 = vsub.f32 1.0, %v879_v18  ;;  %1541 = vtanh.f32 %v2081_v31  ;;  %v2116_v32 = vmul.f32 %v1536_v19, %v876_v28  ;;  %v557_v44 = vpop.f32.mrf.mxu1 }
 0x125   : > { %v558_v31 = vadd.f32 %v557_v44, %v493_v39  ;;  %vm898_vm15 = vweird.f32 %v2107_v16  ;;  %v905_v5 = vor.u32 1.1754944e-38, %v904_v56  ;;  %vm903_vm1 = vcmp.eq.f32.partialorder %v902_v62, 8.507059e+37 }
 0x126   : > { %v688_v29 = vadd.f32 %v687_v22, %v623_v25  ;;  %v881_v24 = vmul.f32 %v1534_v15, %v880_v26 }
 0x127   : > { %v2130_v58 = vpop.f32.mrf.mxu0 }
 0x128   : > { %v1538_v35 = vpop.eup %1537  ;;  %v1406_v38 = vmul.f32 -1.442695, %v688_v29  ;;  %v882_v40 = vadd.f32 %v1534_v15, %v881_v24 }
 0x129   : > { %v1540_v42 = vpop.eup %1539  ;;  %v780_v43 = vadd.f32 1.0, %v1538_v35 }
 0x12a   : > { %1543 = vpow2.f32 %v1406_v38  ;;  %v894_v45 = vmul.f32 %v1540_v42, %v2107_v16  ;;  %v1542_v47 = vpop.eup %1541  ;;  %v886_v53 = vsel %vm885_vm12, %v1534_v15, %v882_v40  ;;  %vm899_vm14 = vweird.f32 %v1540_v42 }
 0x12b   : > { %1545 = vrcp.f32 %v780_v43  ;;  %v2123_v48 = vpop.f32.mrf.mxu2  ;;  %v891_v54 = vsel %vm888_vm13, %v890_v51, %v886_v53  ;;  %vm900_vm0 = vmor %vm898_vm15, %vm899_vm14  ;;  %v919_v13 = vand.u32 2147483648, %v780_v43  ;;  %v917_v16 = vand.u32 2147483647, %v780_v43 }
 0x12c   : > { %v2125_v50 = vpop.f32.mrf.mxu3  ;;  %v895_v52 = vsub.f32 1.0, %v894_v45  ;;  %1547 = vtanh.f32 %v2095_v57  ;;  %v2128_v49 = vmul.f32 %v1542_v47, %v891_v54  ;;  %v2134_v1 = vpop.f32.mrf.mxu1  ;;  %vm913_vm3 = vweird.f32 %v780_v43 }
 0x12d   : > { %v920_v23 = vor.u32 1.1754944e-38, %v919_v13  ;;  %vm918_vm5 = vcmp.eq.f32.partialorder %v917_v16, 8.507059e+37  ;;  %v626_v62 = vadd.f32 %v2123_v48, %v2021_v37 }
 0x12e   : > { %v896_v55 = vmul.f32 %v1540_v42, %v895_v52 }
 0x12f   : > { %v2140_v14 = vpop.f32.mrf.mxu0 }
 0x130   : > { %v1544_v59 = vpop.eup %1543  ;;  %v897_v60 = vadd.f32 %v1540_v42, %v896_v55 }
 0x131   : > { %v1546_v63 = vpop.eup %1545  ;;  %v781_v0 = vadd.f32 1.0, %v1544_v59 }
 0x132   : > { %v909_v2 = vmul.f32 %v1546_v63, %v780_v43  ;;  %v1548_v57 = vpop.eup %1547  ;;  %v901_v9 = vsel %vm900_vm0, %v1540_v42, %v897_v60  ;;  %vm914_vm2 = vweird.f32 %v1546_v63 }
 0x133   : > { %1549 = vrcp.f32 %v781_v0  ;;  %v628_v3 = vpop.f32.mrf.mxu2  ;;  %v906_v10 = vsel %vm903_vm1, %v905_v5, %v901_v9  ;;  %vm915_vm4 = vmor %vm913_vm3, %vm914_vm2  ;;  %v934_v24 = vand.u32 2147483648, %v781_v0  ;;  %v932_v33 = vand.u32 2147483647, %v781_v0 }
 0x134   : > { %v693_v4 = vpop.f32.mrf.mxu3  ;;  %v910_v7 = vsub.f32 1.0, %v909_v2  ;;  %1551 = vtanh.f32 %v2109_v17  ;;  %v2138_v12 = vmul.f32 %v1548_v57, %v906_v10  ;;  %v2142_v25 = vpop.f32.mrf.mxu1  ;;  %vm928_vm7 = vweird.f32 %v781_v0 }
 0x135   : > { %1553 = vtanh.f32 %v558_v31  ;;  %v935_v40 = vor.u32 1.1754944e-38, %v934_v24  ;;  %vm933_vm9 = vcmp.eq.f32.partialorder %v932_v33, 8.507059e+37  ;;  %v629_v52 = vadd.f32 %v628_v3, %v2021_v37 }
 0x136   : > { %v911_v11 = vmul.f32 %v1546_v63, %v910_v7  ;;  %v691_v7 = vadd.f32 %v2125_v50, %v626_v62 }
 0x137   : > { %v2146_v34 = vpop.f32.mrf.mxu0 }
 0x138   : > { %v912_v15 = vadd.f32 %v1546_v63, %v911_v11 }
 0x139   : > { %v1550_v8 = vpop.eup %1549 }
 0x13a   : > { %v924_v18 = vmul.f32 %v1550_v8, %v781_v0  ;;  %v1552_v19 = vpop.eup %1551  ;;  %v916_v26 = vsel %vm915_vm4, %v1546_v63, %v912_v15  ;;  %vm929_vm6 = vweird.f32 %v1550_v8  ;;  %v694_v63 = vadd.f32 %v693_v4, %v629_v52 }
 0x13b   : > { %v631_v21 = vpop.f32.mrf.mxu2  ;;  %v921_v27 = vsel %vm918_vm5, %v920_v23, %v916_v26  ;;  %v1554_v35 = vpop.eup %1553  ;;  %vm930_vm8 = vmor %vm928_vm7, %vm929_vm6  ;;  %v1407_v15 = vmul.f32 -1.442695, %v691_v7  ;;  %v502_v52 = vadd.f32 %v2146_v34, %v2025_v41 }
 0x13c   : > { %v696_v22 = vpop.f32.mrf.mxu3  ;;  %v925_v17 = vsub.f32 1.0, %v924_v18  ;;  %v2144_v29 = vmul.f32 %v1552_v19, %v921_v27  ;;  %v2149_v31 = vpop.f32.mrf.mxu1  ;;  %v632_v47 = vadd.f32 %v631_v21, %v2021_v37  ;;  %v1408_v3 = vmul.f32 -1.442695, %v694_v63 }
 0x13e   : > { %v926_v28 = vmul.f32 %v1550_v8, %v925_v17  ;;  %v697_v53 = vadd.f32 %v696_v22, %v632_v47 }
 0x13f   : > { %v504_v60 = vpop.f32.mrf.mxu0 }
 0x140   : > { %v927_v30 = vadd.f32 %v1550_v8, %v926_v28  ;;  %v1409_v2 = vmul.f32 -1.442695, %v697_v53  ;;  %v505_v62 = vadd.f32 %v504_v60, %v2025_v41 }
 0x142   : > { %v931_v43 = vsel %vm930_vm8, %v1550_v8, %v927_v30 }
 0x143   : > { %v634_v38 = vpop.f32.mrf.mxu2  ;;  %v936_v44 = vsel %vm933_vm9, %v935_v40, %v931_v43 }
 0x144   : > { %v699_v39 = vpop.f32.mrf.mxu3  ;;  %v635_v42 = vadd.f32 %v634_v38, %v2021_v37  ;;  %v2151_v45 = vmul.f32 %v1554_v35, %v936_v44  ;;  %v2158_v5 = vpop.f32.mrf.mxu1 }
 0x146   : > { %v700_v51 = vadd.f32 %v699_v39, %v635_v42 }
 0x147   : > { %v507_v4 = vpop.f32.mrf.mxu0 }
 0x148   : > { %v1410_v54 = vmul.f32 -1.442695, %v700_v51  ;;  %v508_v44 = vadd.f32 %v507_v4, %v2025_v41 }
 0x14a   : > { %1555 = vpow2.f32 %v1410_v54 }
 0x14b   : > { %v637_v55 = vpop.f32.mrf.mxu2 }
 0x14c   : > { %v702_v56 = vpop.f32.mrf.mxu3  ;;  %v638_v59 = vadd.f32 %v637_v55, %v2021_v37  ;;  %v572_v50 = vpop.f32.mrf.mxu1 }
 0x14d   : > { %v573_v63 = vadd.f32 %v572_v50, %v508_v44 }
 0x14e   : > { %v703_v0 = vadd.f32 %v702_v56, %v638_v59 }
 0x14f   : > { %v510_v27 = vpop.f32.mrf.mxu0 }
 0x150   : > { %v1411_v57 = vmul.f32 -1.442695, %v703_v0  ;;  %v1556_v13 = vpop.eup %1555  ;;  %v511_v38 = vadd.f32 %v510_v27, %v2025_v41  ;;  %v499_v0 = vadd.f32 %v2140_v14, %v2025_v41  ;;  %v570_v14 = vadd.f32 %v2158_v5, %v505_v62 }
 0x151   : > { %v2162_v8 = vadd.f32 1.0, %v1556_v13 }
 0x152   : > { %1557 = vpow2.f32 %v1411_v57 }
 0x153   : > { %1559 = vpow2.f32 %v1409_v2  ;;  %v640_v9 = vpop.f32.mrf.mxu2  ;;  %v567_v2 = vadd.f32 %v2149_v31, %v502_v52  ;;  %vm988_vm3 = vweird.f32 %v2162_v8 }
 0x154   : > { %v705_v10 = vpop.f32.mrf.mxu3  ;;  %v641_v11 = vadd.f32 %v640_v9, %v2021_v37  ;;  %1561 = vpow2.f32 %v1408_v3  ;;  %v575_v39 = vpop.f32.mrf.mxu1 }
 0x155   : > { %1563 = vpow2.f32 %v1407_v15  ;;  %v576_v47 = vadd.f32 %v575_v39, %v511_v38  ;;  %v992_v38 = vand.u32 2147483647, %v2162_v8 }
 0x156   : > { %v706_v48 = vadd.f32 %v705_v10, %v641_v11 }
 0x157   : > { %vm993_vm6 = vcmp.eq.f32.partialorder %v992_v38, 8.507059e+37 }
 0x158   : > { %v1558_v16 = vpop.eup %1557  ;;  %v1412_v18 = vmul.f32 -1.442695, %v706_v48 }
 0x159   : > { %v1560_v19 = vpop.eup %1559  ;;  %v2164_v21 = vadd.f32 1.0, %v1558_v16 }
 0x15a   : > { %1565 = vpow2.f32 %v1412_v18  ;;  %v1562_v22 = vpop.eup %1561  ;;  %v2167_v23 = vadd.f32 1.0, %v1560_v19 }
 0x15b   : > { %1567 = vrcp.f32 %v2164_v21  ;;  %v2170_v37 = vadd.f32 1.0, %v1562_v22  ;;  %v1564_v17 = vpop.eup %1563  ;;  %vm1003_vm12 = vweird.f32 %v2164_v21  ;;  %v1009_v31 = vand.u32 2147483648, %v2164_v21 }
 0x15c   : > { %1569 = vrcp.f32 %v2162_v8  ;;  %v2180_v35 = vadd.f32 1.0, %v1564_v17  ;;  %v1007_v4 = vand.u32 2147483647, %v2164_v21  ;;  %vm973_vm7 = vweird.f32 %v2167_v23 }
 0x15d   : > { %1571 = vrcp.f32 %v2167_v23  ;;  %v1010_v27 = vor.u32 1.1754944e-38, %v1009_v31 }
 0x15e   : > { %1573 = vrcp.f32 %v2170_v37  ;;  %vm1008_vm2 = vcmp.eq.f32.partialorder %v1007_v4, 8.507059e+37 }
 0x160   : > { %v1566_v26 = vpop.eup %1565 }
 0x161   : > { %v2173_v28 = vpop.eup %1567  ;;  %v787_v24 = vadd.f32 1.0, %v1566_v26 }
 0x162   : > { %v2175_v30 = vpop.eup %1569  ;;  %v999_v33 = vmul.f32 %v2173_v28, %v2164_v21  ;;  %vm1004_vm10 = vweird.f32 %v2173_v28 }
 0x163   : > { %1575 = vrcp.f32 %v787_v24  ;;  %v984_v40 = vmul.f32 %v2175_v30, %v2162_v8  ;;  %v2185_v42 = vpop.eup %1571  ;;  %v1024_v3 = vand.u32 2147483648, %v787_v24  ;;  %v1022_v11 = vand.u32 2147483647, %v787_v24  ;;  %vm2210_vm14 = vmor %vm1003_vm12, %vm1004_vm10 }
 0x164   : > { %v1000_v43 = vsub.f32 1.0, %v999_v33  ;;  %1577 = vrcp.f32 %v2180_v35  ;;  %v2189_v51 = vpop.eup %1573  ;;  %v969_v55 = vmul.f32 %v2185_v42, %v2167_v23  ;;  %vm1018_vm13 = vweird.f32 %v787_v24 }
 0x165   : > { %v985_v54 = vsub.f32 1.0, %v984_v40  ;;  %1579 = vtanh.f32 %v576_v47  ;;  %v954_v34 = vmul.f32 %v2189_v51, %v2170_v37  ;;  %v1025_v19 = vor.u32 1.1754944e-38, %v1024_v3 }
 0x166   : > { %v1001_v59 = vmul.f32 %v2173_v28, %v1000_v43  ;;  %v970_v10 = vsub.f32 1.0, %v969_v55  ;;  %1581 = vtanh.f32 %v573_v63  ;;  %vm989_vm0 = vweird.f32 %v2175_v30 }
 0x167   : > { %v986_v9 = vmul.f32 %v2175_v30, %v985_v54  ;;  %v955_v50 = vsub.f32 1.0, %v954_v34  ;;  %vm1023_vm1 = vcmp.eq.f32.partialorder %v1022_v11, 8.507059e+37  ;;  %1583 = vtanh.f32 %v570_v14  ;;  %vm2230_vm4 = vmor %vm988_vm3, %vm989_vm0 }
 0x168   : > { %v1002_v13 = vadd.f32 %v2173_v28, %v1001_v59  ;;  %v971_v5 = vmul.f32 %v2185_v42, %v970_v10  ;;  %v496_v40 = vadd.f32 %v2130_v58, %v2025_v41  ;;  %vm974_vm5 = vweird.f32 %v2185_v42 }
 0x169   : > { %v1576_v53 = vpop.eup %1575  ;;  %v987_v26 = vadd.f32 %v2175_v30, %v986_v9  ;;  %v564_v41 = vadd.f32 %v2142_v25, %v499_v0  ;;  %1585 = vtanh.f32 %v567_v2  ;;  %v977_v55 = vand.u32 2147483647, %v2167_v23  ;;  %vm2244_vm8 = vmor %vm973_vm7, %vm974_vm5 }
 0x16a   : > { %v1014_v56 = vmul.f32 %v1576_v53, %v787_v24  ;;  %v2202_v7 = vpop.eup %1577  ;;  %vm1019_vm11 = vweird.f32 %v1576_v53  ;;  %v1006_v17 = vsel %vm2210_vm14, %v2173_v28, %v1002_v13  ;;  %v994_v24 = vand.u32 2147483648, %v2162_v8 }
 0x16b   : > { %v939_v16 = vmul.f32 %v2202_v7, %v2180_v35  ;;  %v1580_v18 = vpop.eup %1579  ;;  %vm1020_vm15 = vmor %vm1018_vm13, %vm1019_vm11  ;;  %v1011_v43 = vsel %vm1008_vm2, %v1010_v27, %v1006_v17  ;;  %v991_v47 = vsel %vm2230_vm4, %v2175_v30, %v987_v26  ;;  %v972_v52 = vadd.f32 %v2185_v42, %v971_v5 }
 0x16c   : > { %v1015_v57 = vsub.f32 1.0, %v1014_v56  ;;  %v1582_v39 = vpop.eup %1581  ;;  %v956_v8 = vmul.f32 %v2189_v51, %v955_v50  ;;  %v995_v58 = vor.u32 1.1754944e-38, %v994_v24  ;;  %vm959_vm9 = vweird.f32 %v2189_v51 }
 0x16d   : > { %v940_v44 = vsub.f32 1.0, %v939_v16  ;;  %v1042_v54 = vmul.f32 %v1582_v39, %v1011_v43  ;;  %v1584_v56 = vpop.eup %1583  ;;  %v976_v25 = vsel %vm2244_vm8, %v2185_v42, %v972_v52  ;;  %v561_v0 = vadd.f32 %v2134_v1, %v496_v40  ;;  %v1105_v40 = vld [vmem:[#allocation3] sm:$0x1] }
 0x16e   : > { %v1016_v60 = vmul.f32 %v1576_v53, %v1015_v57  ;;  %v996_v30 = vsel %vm993_vm6, %v995_v58, %v991_v47  ;;  %v957_v62 = vadd.f32 %v2189_v51, %v956_v8  ;;  %1587 = vtanh.f32 %v564_v41  ;;  %v1113_v8 = vld [vmem:[#allocation4] sm:$0x3] }
 0x16f   : > { %v941_v63 = vmul.f32 %v2202_v7, %v940_v44  ;;  %v964_v2 = vand.u32 2147483648, %v2170_v37  ;;  %v1041_v57 = vmul.f32 %v1584_v56, %v996_v30  ;;  %vm978_vm10 = vcmp.eq.f32.partialorder %v977_v55, 8.507059e+37  ;;  %v1586_v3 = vpop.eup %1585 }
 0x170   : > { %v1017_v15 = vadd.f32 %v1576_v53, %v1016_v60  ;;  %vm958_vm11 = vweird.f32 %v2170_v37  ;;  %v962_v34 = vand.u32 2147483647, %v2170_v37  ;;  %vm944_vm13 = vweird.f32 %v2202_v7 }
 0x171   : > { %vm960_vm12 = vmor %vm958_vm11, %vm959_vm9  ;;  %v942_v10 = vadd.f32 %v2202_v7, %v941_v63  ;;  %1589 = vtanh.f32 %v561_v0  ;;  %v965_v1 = vor.u32 1.1754944e-38, %v964_v2  ;;  %v949_v60 = vand.u32 2147483648, %v2180_v35 }
 0x172   : > { %v1021_v22 = vsel %vm1020_vm15, %v1576_v53, %v1017_v15  ;;  %v979_v53 = vand.u32 2147483648, %v2167_v23  ;;  %v961_v9 = vsel %vm960_vm12, %v2189_v51, %v957_v62  ;;  %vm963_vm14 = vcmp.eq.f32.partialorder %v962_v34, 8.507059e+37 }
 0x173   : > { %v1026_v21 = vsel %vm1023_vm1, %v1025_v19, %v1021_v22  ;;  %vm943_vm15 = vweird.f32 %v2180_v35  ;;  %v947_v37 = vand.u32 2147483647, %v2180_v35  ;;  %v966_v14 = vsel %vm963_vm14, %v965_v1, %v961_v9  ;;  %v1087_v19 = vld [vmem:[#allocation2] sm:$0x1] }
 0x174   : > { %v1043_v33 = vmul.f32 %v1580_v18, %v1026_v21  ;;  %v980_v23 = vor.u32 1.1754944e-38, %v979_v53  ;;  %v1588_v13 = vpop.eup %1587  ;;  %vm945_vm0 = vmor %vm943_vm15, %vm944_vm13  ;;  %v950_v31 = vor.u32 1.1754944e-38, %v949_v60  ;;  %v1045_v18 = vld [vmem:[#allocation5] sm:$0x1]  ;;  %v1769_v35 = vmov 0  }
 0x175   : > { %v946_v51 = vsel %vm945_vm0, %v2202_v7, %v942_v10  ;;  %v1039_v15 = vmul.f32 %v1588_v13, %v966_v14  ;;  %vm948_vm1 = vcmp.eq.f32.partialorder %v947_v37, 8.507059e+37  ;;  %1493 = vset.pattern.permute.xlu0 %v1769_v35  ;;  %1494 = vset.pattern.permute.xlu1 %v1769_v35  ;;  %vm1088_vm4 = vcmask 1040384  }
 0x176   : > { %1052 = vmatpush.xpose.msrb.mxu0 %v1043_v33  ;;  %v981_v42 = vsel %vm978_vm10, %v980_v23, %v976_v25  ;;  %v951_v4 = vsel %vm948_vm1, %v950_v31, %v946_v51  ;;  %1048 = vperm.xlu0 %1493, %v1045_v18   ;;  %vm1111_vm5 = vcmask 0  }
 0x177   : > { %v1040_v11 = vmul.f32 %v1586_v3, %v981_v42  ;;  %v1590_v48 = vpop.eup %1589 }
 0x178   : > { %v1038_v16 = vmul.f32 %v1590_v48, %v951_v4 }
 0x17a   : > { %1053 = vmatpush.xpose.msrb.mxu0 %v1042_v54 }
 0x17e   : > { %1054 = vmatpush.xpose.msrb.mxu0 %v1041_v57 }
 0x182   : > { %1055 = vmatpush.xpose.msrb.mxu0 %v1040_v11 }
 0x186   : > { %1056 = vmatpush.xpose.msrb.mxu0 %v1039_v15 }
 0x18a   : > { %1057 = vmatpush.xpose.msrb.mxu0 %v1038_v16 }
 0x18e   : > { %1058 = vmatpush.xpose.msrb.mxu0 %v2151_v45  ;;  %v1075_v45 = vstv %s1413_s13 }
 0x192   : > { %1059 = vmatpush.xpose.msrb.mxu0 %v2144_v29  ;;  %v1072_v29 = vlaneseq }
 0x194   : > { %vm1084_vm3 = vcmp.lt.s32.totalorder %v1072_v29, 128  ;;  %vm2284_vm6 = vcmp.lt.s32.totalorder %v1072_v29, 256 }
 0x196   : > { %1060 = vmatpush.xpose.msrb.mxu0 %v2138_v12  ;;  %v1044_v12 = vld [vmem:[%s2427_s3] sm:$0x1] }
 0x19a   : > { %1061 = vmatpush.xpose.msrb.mxu0 %v2128_v49  ;;  %v1073_v49 = vand.u32 127, %v1072_v29 }
 0x19c   : > { %v1076_v7 = vadd.s32 %v1075_v45, %v1073_v49 }
 0x19e   : > { %1062 = vmatpush.xpose.msrb.mxu0 %v2116_v32  ;;  %vm1077_vm2 = vcmp.lt.s32.totalorder %v1076_v7, 200 }
 0x1a2   : > { %1063 = vmatpush.xpose.msrb.mxu0 %v2102_v6 }
 0x1a6   : > { %1064 = vmatpush.xpose.msrb.mxu0 %v2088_v46 }
 0x1aa   : > { %1065 = vmatpush.xpose.msrb.mxu0 %v2074_v20 }
 0x1ae   : > { %1066 = vmatpush.xpose.msrb.mxu0 %v2060_v61 }
 0x1b2   : > { %1067 = vmatpush.xpose.msrb.mxu0 %v2046_v36 }
 0x1b5   : > { %1068 = vmatmul.f32.vlgmr.msrb.gmra.mxu0 %v1044_v12 }
 0x1e8   : > { %v1049_v32 = vpop.permute.xlu0 %1048 }
 0x1e9   : > { %v1051_v6 = vperm.slane %v1049_v32, 0 }
 0x232   : > { %v1069_v46 = vpop.f32.mrf.mxu0 }
 0x233   : > { %v1070_v20 = vadd.f32 %v1069_v46, %v1051_v6 }
 0x235   : > { %v1078_v61 = vsel %vm1077_vm2, %v1070_v20, -1e+30 }
 0x236   : > { %1086 = vst.msk [vmem:[%s1081_s14] sm:$0x1] %vm1084_vm3, %v1078_v61  ;;  %v1089_v36 = vsel %vm1088_vm4, %v1078_v61, -inf }
 0x237   : > { %1090 = vmax.xlane.f32.xlu0 %v1089_v36 }
 0x2aa   : > { %v1091_v5 = vpop.xlane.xlu0 %1090 }
 0x2ab   : > { %v1092_v50 = vmax.f32 %v1087_v19, %v1091_v5 }
 0x2ad   : > { %v1093_v22 = vsub.f32 %v1087_v19, %v1092_v50  ;;  %1170 = vst.msk [vmem:[#allocation2] sm:$0x1] %vm1111_vm5, %v1092_v50  ;;  %1098 = vperm.xlu1 %1494, %v1092_v50  }
 0x2af   : > { %v1094_v17 = vmul.f32 1.442695, %v1093_v22 }
 0x2b1   : > { %1591 = vpow2.f32 %v1094_v17 }
 0x2b7   : > { %v1592_v26 = vpop.eup %1591 }
 0x2b8   : > { %1116 = vperm.xlu1 %1494, %v1592_v26   ;;  %v1106_v43 = vmul.f32 %v1592_v26, %v1105_v40 }
 0x31f   : > { %v1099_v21 = vpop.permute.xlu1 %1098 }
 0x320   : > { %v1101_v27 = vperm.slane %v1099_v21, 0 }
 0x322   : > { %v1102_v24 = vsub.f32 %v1078_v61, %v1101_v27 }
 0x324   : > { %v1103_v33 = vmul.f32 1.442695, %v1102_v24 }
 0x326   : > { %1593 = vpow2.f32 %v1103_v33 }
 0x32a   : > { %v1117_v47 = vpop.permute.xlu1 %1116 }
 0x32b   : > { %v1119_v52 = vperm.slane %v1117_v47, 0 }
 0x32c   : > { %v1594_v38 = vpop.eup %1593 }
 0x32d   : > { %1137 = vmatmul.f32.vlgmr.msrb.gmra.mxu1 %v1594_v38  ;;  %1157 = vmatmul.f32.vlgmr.msrb.gmra.mxu2 %v1594_v38  ;;  %v1107_v39 = vsel %vm1088_vm4, %v1594_v38, 0.0  ;;  %v1120_v53 = vmul.f32 %v1119_v52, %v1113_v8 }
 0x32e   : > { %1108 = vadd.xlane.f32.xlu2 %v1107_v39 }
 0x3a1   : > { %v1109_v28 = vpop.xlane.xlu2 %1108 }
 0x3a2   : > { %v1110_v44 = vadd.f32 %v1109_v28, %v1106_v43 }
 0x3a4   : > { %1112 = vst.msk [vmem:[#allocation3] sm:$0x1] %vm1111_vm5, %v1110_v44 }
 0x3aa   : > { %v1138_v54 = vpop.f32.mrf.mxu1 }
 0x3b0   : > { %v1158_v41 = vpop.f32.mrf.mxu2 }
 0x3b1   : > { %v1163_v58 = vrot.slane %v1158_v41, 7 }
 0x3b2   : > { %1174 = sbr.rel (%p1414_p1) target bundleno = 1221 (0x4c5), region = 64 }
 0x3b3   : > { %v1164_v55 = vsel %vm1088_vm4, %v1138_v54, %v1163_v58 }
 0x3b4   : > { %v1166_v30 = vadd.f32 %v1164_v55, %v1120_v53 }
 0x3b6   : > { %1169 = vst.msk [vmem:[#allocation4] sm:$0x3] %vm2284_vm6, %v1166_v30 }
 0x3b7   : > { %v1175_v59 = vld [vmem:[#allocation3] sm:$0x1]  ;;  %v1213_v25 = vld [vmem:[%s2429_s5 + $0x78] sm:$0xff]  ;;  %v1770_v62 = vmov 0   ;;  %v1212_v0 = vld [vmem:[%s2429_s5 + $0x70] sm:$0xff]  ;;  %vm1276_vm11 = vcmask 8192  }
 0x3b8   : > { %1595 = vset.pattern.permute.xlu0 %v1770_v62  ;;  %1596 = vrcp.f32 %v1175_v59  ;;  %1236 = vmatpush.msra.mxu0 %v1213_v25  ;;  %v1229_v63 = vld [vmem:[%s2429_s5 + $0xf8] sm:$0xff]  ;;  %v1228_v23 = vld [vmem:[%s2429_s5 + $0xf0] sm:$0xff]  ;;  %v1211_v2 = vld [vmem:[%s2429_s5 + $0x68] sm:$0xff]  ;;  %v1187_v11 = vand.u32 2147483648, %v1175_v59  ;;  %vm1181_vm7 = vweird.f32 %v1175_v59  ;;  %v1185_v14 = vand.u32 2147483647, %v1175_v59 }
 0x3b9   : > { %1256 = vmatpush.msra.mxu1 %v1229_v63  ;;  %v1227_v57 = vld [vmem:[%s2429_s5 + $0xe8] sm:$0xff]  ;;  %v1210_v34 = vld [vmem:[%s2429_s5 + $0x60] sm:$0xff]  ;;  %v1209_v42 = vld [vmem:[%s2429_s5 + $0x58] sm:$0xff] }
 0x3ba   : > { %1237 = vmatpush.msra.mxu0 %v1212_v0  ;;  %v1226_v3 = vld [vmem:[%s2429_s5 + $0xe0] sm:$0xff]  ;;  %v1225_v10 = vld [vmem:[%s2429_s5 + $0xd8] sm:$0xff]  ;;  %v1208_v60 = vld [vmem:[%s2429_s5 + $0x50] sm:$0xff]  ;;  %v1188_v4 = vor.u32 1.1754944e-38, %v1187_v11  ;;  %vm1186_vm10 = vcmp.eq.f32.partialorder %v1185_v14, 8.507059e+37 }
 0x3bb   : > { %1257 = vmatpush.msra.mxu1 %v1228_v23  ;;  %v1224_v37 = vld [vmem:[%s2429_s5 + $0xd0] sm:$0xff]  ;;  %v1207_v51 = vld [vmem:[%s2429_s5 + $0x48] sm:$0xff]  ;;  %v1206_v48 = vld [vmem:[%s2429_s5 + $0x40] sm:$0xff] }
 0x3bc   : > { %1238 = vmatpush.msra.mxu0 %v1211_v2  ;;  %v1223_v31 = vld [vmem:[%s2429_s5 + $0xc8] sm:$0xff]  ;;  %v1222_v16 = vld [vmem:[%s2429_s5 + $0xc0] sm:$0xff]  ;;  %v1205_v35 = vld [vmem:[%s2429_s5 + $0x38] sm:$0xff] }
 0x3bd   : > { %1258 = vmatpush.msra.mxu1 %v1227_v57  ;;  %v1221_v12 = vld [vmem:[%s2429_s5 + $0xb8] sm:$0xff]  ;;  %v1204_v49 = vld [vmem:[%s2429_s5 + $0x30] sm:$0xff]  ;;  %v1203_v7 = vld [vmem:[%s2429_s5 + $0x28] sm:$0xff] }
 0x3be   : > { %v1597_v9 = vpop.eup %1596  ;;  %1239 = vmatpush.msra.mxu0 %v1210_v34  ;;  %v1220_v32 = vld [vmem:[%s2429_s5 + $0xb0] sm:$0xff]  ;;  %v1219_v6 = vld [vmem:[%s2429_s5 + $0xa8] sm:$0xff]  ;;  %v1202_v46 = vld [vmem:[%s2429_s5 + $0x20] sm:$0xff] }
 0x3bf   : > { %v1177_v1 = vmul.f32 %v1597_v9, %v1175_v59  ;;  %1259 = vmatpush.msra.mxu1 %v1226_v3  ;;  %vm1182_vm8 = vweird.f32 %v1597_v9  ;;  %v1218_v20 = vld [vmem:[%s2429_s5 + $0xa0] sm:$0xff]  ;;  %v1201_v61 = vld [vmem:[%s2429_s5 + $0x18] sm:$0xff]  ;;  %v1200_v5 = vld [vmem:[%s2429_s5 + $0x10] sm:$0xff] }
 0x3c0   : > { %1240 = vmatpush.msra.mxu0 %v1209_v42  ;;  %vm1183_vm9 = vmor %vm1181_vm7, %vm1182_vm8  ;;  %v1279_v36 = vld [vmem:[#allocation2] sm:$0x1]  ;;  %v1217_v19 = vld [vmem:[%s2429_s5 + $0x98] sm:$0xff] }
 0x3c1   : > { %v1178_v13 = vsub.f32 1.0, %v1177_v1  ;;  %1260 = vmatpush.msra.mxu1 %v1225_v10  ;;  %v1216_v50 = vld [vmem:[%s2429_s5 + $0x90] sm:$0xff]  ;;  %v1199_v22 = vld [vmem:[%s2429_s5 + $0x8] sm:$0xff]  ;;  %v1198_v26 = vld [vmem:[%s2429_s5] sm:$0xff] }
 0x3c2   : > { %1241 = vmatpush.msra.mxu0 %v1208_v60  ;;  %v1215_v17 = vld [vmem:[%s2429_s5 + $0x88] sm:$0xff]  ;;  %v1214_v21 = vld [vmem:[%s2429_s5 + $0x80] sm:$0xff] }
 0x3c3   : > { %v1179_v15 = vmul.f32 %v1597_v9, %v1178_v13  ;;  %1261 = vmatpush.msra.mxu1 %v1224_v37  ;;  %v1190_v27 = vld [vmem:[#allocation4] sm:$0x3]  ;;  %v1278_v43 = vld [vmem:[#allocation12] sm:$0x3]  ;;  %v1230_v58 = vld [vmem:[%s2430_s6] sm:$0x1] }
 0x3c4   : > { %1242 = vmatpush.msra.mxu0 %v1207_v51 }
 0x3c5   : > { %v1180_v18 = vadd.f32 %v1597_v9, %v1179_v15  ;;  %1262 = vmatpush.msra.mxu1 %v1223_v31 }
 0x3c6   : > { %1243 = vmatpush.msra.mxu0 %v1206_v48 }
 0x3c7   : > { %v1184_v29 = vsel %vm1183_vm9, %v1597_v9, %v1180_v18  ;;  %1263 = vmatpush.msra.mxu1 %v1222_v16 }
 0x3c8   : > { %v1189_v45 = vsel %vm1186_vm10, %v1188_v4, %v1184_v29  ;;  %1244 = vmatpush.msra.mxu0 %v1205_v35 }
 0x3c9   : > { %1193 = vperm.xlu0 %1595, %v1189_v45   ;;  %1264 = vmatpush.msra.mxu1 %v1221_v12 }
 0x3ca   : > { %1245 = vmatpush.msra.mxu0 %v1204_v49 }
 0x3cb   : > { %1265 = vmatpush.msra.mxu1 %v1220_v32 }
 0x3cc   : > { %1246 = vmatpush.msra.mxu0 %v1203_v7 }
 0x3cd   : > { %1266 = vmatpush.msra.mxu1 %v1219_v6 }
 0x3ce   : > { %1247 = vmatpush.msra.mxu0 %v1202_v46 }
 0x3cf   : > { %1267 = vmatpush.msra.mxu1 %v1218_v20 }
 0x3d0   : > { %1248 = vmatpush.msra.mxu0 %v1201_v61 }
 0x3d1   : > { %1282 = vperm.xlu0 %1595, %v1279_v36   ;;  %1268 = vmatpush.msra.mxu1 %v1217_v19 }
 0x3d2   : > { %1249 = vmatpush.msra.mxu0 %v1200_v5 }
 0x3d3   : > { %1269 = vmatpush.msra.mxu1 %v1216_v50 }
 0x3d4   : > { %1250 = vmatpush.msra.mxu0 %v1199_v22 }
 0x3d5   : > { %1270 = vmatpush.msra.mxu1 %v1215_v17 }
 0x3d6   : > { %1251 = vmatpush.msra.mxu0 %v1198_v26 }
 0x3d7   : > { %1271 = vmatpush.msra.mxu1 %v1214_v21 }
 0x43b   : > { %v1194_v24 = vpop.permute.xlu0 %1193 }
 0x43c   : > { %v1196_v33 = vperm.slane %v1194_v24, 0 }
 0x43e   : > { %v1197_v38 = vmul.f32 %v1196_v33, %v1190_v27 }
 0x440   : > { %v1232_v39 = vperm.slane %v1197_v38, 0  ;;  %v1233_v40 = vperm.slane %v1197_v38, 1 }
 0x442   : > { %1252 = vmatmul.f32.vlgmr.msra.gmra.mxu0 %v1232_v39  ;;  %1272 = vmatmul.f32.vlgmr.msra.gmra.mxu1 %v1233_v40 }
 0x443   : > { %v1283_v28 = vpop.permute.xlu0 %1282 }
 0x444   : > { %v1285_v44 = vperm.slane %v1283_v28, 0 }
 0x446   : > { %v1286_v47 = vsub.f32 %v1278_v43, %v1285_v44 }
 0x448   : > { %v1287_v52 = vmul.f32 1.442695, %v1286_v47 }
 0x44a   : > { %1598 = vpow2.f32 %v1287_v52 }
 0x450   : > { %v1599_v8 = vpop.eup %1598 }
 0x451   : > { %v1289_v41 = vmul.f32 %v1599_v8, %v1196_v33 }
 0x453   : > { %1290 = vst.msk [vmem:[#allocation12] sm:$0x3] %vm2284_vm6, %v1289_v41 }
 0x4bf   : > { %v1253_v53 = vpop.f32.mrf.mxu0  ;;  %v1273_v55 = vpop.f32.mrf.mxu1 }
 0x4c0   : > { %v1254_v54 = vadd.f32 %v1253_v53, %v1230_v58 }
 0x4c2   : > { %v1274_v30 = vadd.f32 %v1273_v55, %v1254_v54 }
 0x4c4   : > { %1277 = vst.msk [vmem:[#allocation11] sm:$0x1] %vm1276_vm11, %v1274_v30 }
 0x4c5 PF: > { %p1448_p4 = scmp.eq.s32.totalorder %s1840_s4, 1  ;;  %s1771_s15 = smov [#allocation11]  }
 0x4c6   : > { %s1297_s19 = sshll.u32 %s1771_s15, 4  ;;  %s1299_s16 = sshll.u32 %s2431_s7, 4  ;;  %s1298_s19 = int_to_ptr.vmem [resolvable:$true] %s1297_s19  ;;  %s1300_s16 = int_to_ptr.hbm [resolvable:$true] %s1299_s16 }
 0x4c7   : > { %1430 = dma.vmem_to_hbm [thread:$0]  (%p1448_p4), %s1298_s19, 16, %s1300_s16, [#allocation8]  }
 0x4c8   : > { %s1311_s21 = sshll.u32 %s2432_s8, 4  ;;  %s1772_s22 = smov [#allocation12]   ;;  %s1312_s21 = int_to_ptr.hbm [resolvable:$true] %s1311_s21 }
 0x4c9   : > { %s1309_s25 = sshll.u32 %s1772_s22, 4  ;;  %s1310_s25 = int_to_ptr.vmem [resolvable:$true] %s1309_s25 }
 0x4ca   : > { %1432 = dma.vmem_to_hbm [thread:$0]  (%p1448_p4), %s1310_s25, 32, %s1312_s21, [#allocation13]  }
 0x4cb   : > { %1741 = dma.done.wait (%p1448_p4), [#allocation8], 16  }
 0x4cc   : > { %1743 = vsyncadd (%p1448_p4), [#allocation8], 4294967280 }
 0x4cd   : > { %1745 = dma.done.wait (%p1448_p4), [#allocation13], 32  }
 0x4ce   : > { %1747 = vsyncadd (%p1448_p4), [#allocation13], 4294967264 }
 0x4cf PF: > { %p24_p5 = scmp.ge.s32.totalorder %s1865_s18, 4   ;;  %s2444_s29 = smov %s1754_s30 }
 0x4d0   : > { %s2445_s30 = smov %s1758_s9  ;;  %s2446_s9 = smov %s1878_s23 }
 0x4d1   : > { %s2447_s10 = smov %s1865_s18  ;;  %26 = sbr.rel (!%p24_p5) target bundleno = 9 (0x9), region = 106 }
 0x4d6   :  { %1330 = vsyncpa [#allocation7], 1 }
 0x4d7   :  { %1332 = vsyncpa [#allocation7 + $0x1], 1 }
 0x4d8   :  { %1333 = vsyncpa [#allocation10], 1 }
 0x4d9   :  { %1334 = vsyncpa [#allocation8], 1 }
 0x4da   :  { %1336 = vsyncpa [#allocation8 + $0x1], 1 }
 0x4db   :  { %1337 = vsyncpa [#allocation13], 1 }

</bundles_post_ra>
